<compile_context>
chip_gen: v5e
topology: v5e:2x2
jax: 0.10.0
libtpu: 0.0.40
codegen_flags: <defaults>
</compile_context>

<pallas_src>
import functools
import math

import numpy as np
import jax
import jax.numpy as jnp
from jax.experimental import pallas as pl
from jax.experimental.pallas import tpu as pltpu


# ----------------------------------------------------------------------------
# Kernel
# ----------------------------------------------------------------------------
def _sigmoid(v):
    # exp -> EUP; approx reciprocal -> EUP vrcp path (stays off the VPU chain).
    return pl.reciprocal(1.0 + jnp.exp(-v), approx=True)


def high_kernel(h, w, n_img,
                x_ref, m_ref, dT_ref,
                w3_ref, b3_ref, wud_ref, bud_ref,
                wpa_ref, bpa_ref, wsca_ref, bsca_ref,
                wc1_ref, bc1_ref, w3l_ref, b3l_ref,
                o_ref, col_ref):
    x = x_ref[0]                                   # (C, L) f32, lane-dense
    c, L = x.shape
    hw = h * w

    # 3x3 tap offsets, tap-major (matches host im2col weight layout).
    offs = [(ky - 1) * w + (kx - 1) for ky in range(3) for kx in range(3)]

    def fill_col(v):
        # One XLU lane-rotate per tap; zero padding (and cross-image leakage
        # at packed-image boundaries) handled by host-precomputed masks.
        for i, off in enumerate(offs):
            if off == 0:
                tap = v
            else:
                tap = pltpu.roll(v, shift=(-off) % L, axis=1) \
                      * m_ref[i * c:(i + 1) * c, :]
            col_ref[i * c:(i + 1) * c, :] = tap.astype(col_ref.dtype)

    def conv3x3(v, wcat_ref, b_ref):
        fill_col(v)                                # im2col block lives in VMEM scratch
        return jnp.dot(wcat_ref[...], col_ref[...],
                       preferred_element_type=jnp.float32) + b_ref[...]

    # out = conv_3(x)
    out = conv3x3(x, w3_ref, b3_ref)

    # low = AvgPool(Conv1x1(Bicubic(x))) = Wud @ (x @ dT) + bud, per packed image
    xq = x.astype(dT_ref.dtype)
    xs_parts = [jnp.dot(xq[:, i * hw:(i + 1) * hw], dT_ref[...],
                        preferred_element_type=jnp.float32)
                for i in range(n_img)]
    xs = xs_parts[0] if n_img == 1 else jnp.concatenate(xs_parts, axis=1)
    low = jnp.dot(wud_ref[...], xs,
                  preferred_element_type=jnp.float32) + bud_ref[...]
    hi = x - low                                   # high-frequency info

    # PA: h * sigmoid(conv1x1(h))
    pa = hi * _sigmoid(jnp.dot(wpa_ref[...], hi,
                               preferred_element_type=jnp.float32) + bpa_ref[...])

    # SCA: h * conv1x1(GlobalAvgPool(h))  (per-image GAP over the packed lanes)
    sca_parts = []
    for i in range(n_img):
        hi_i = hi[:, i * hw:(i + 1) * hw]
        gap = jnp.mean(hi_i, axis=1, keepdims=True)           # (C, 1)
        gap_cc = jnp.broadcast_to(gap, (c, c))
        scale = jnp.dot(wsca_ref[...], gap_cc,
                        preferred_element_type=jnp.float32)[:, :1] + bsca_ref[...]
        sca_parts.append(hi_i * scale)
    sca = sca_parts[0] if n_img == 1 else jnp.concatenate(sca_parts, axis=1)

    atten = _sigmoid(jnp.dot(wc1_ref[...], pa + sca,
                             preferred_element_type=jnp.float32) + bc1_ref[...])

    o_ref[0] = conv3x3(atten * out, w3l_ref, b3l_ref).astype(o_ref.dtype)


# ----------------------------------------------------------------------------
# Exact separable operators (PyTorch semantics), built host-side as constants
# ----------------------------------------------------------------------------
_A = -0.75  # PyTorch bicubic coefficient


def _cubic1(t):
    return ((_A + 2.0) * t - (_A + 3.0)) * t * t + 1.0


def _cubic2(t):
    return ((_A * t - 5.0 * _A) * t + 8.0 * _A) * t - 4.0 * _A


def bicubic_matrix(n_in, scale):
    """F.interpolate(mode='bicubic', align_corners=False) along one axis."""
    n_out = int(math.floor(n_in * scale))
    inv = 1.0 / scale
    m = np.zeros((n_out, n_in), dtype=np.float64)
    for i in range(n_out):
        src = (i + 0.5) * inv - 0.5
        i0 = int(math.floor(src))
        t = src - i0
        coeffs = (_cubic2(t + 1.0), _cubic1(t), _cubic1(1.0 - t), _cubic2(2.0 - t))
        for k in range(4):
            j = min(max(i0 - 1 + k, 0), n_in - 1)   # border replication
            m[i, j] += coeffs[k]
    return m


def avgpool_matrix(n_in, k):
    n_out = n_in // k
    m = np.zeros((n_out, n_in), dtype=np.float64)
    for i in range(n_out):
        m[i, i * k:(i + 1) * k] = 1.0 / k
    return m


@functools.lru_cache(maxsize=None)
def _host_constants(c, h, w, scale, n_img):
    """Cached host precompute: composed low-pass operator and conv-tap masks."""
    hw = h * w
    dh = avgpool_matrix(h * scale, scale) @ bicubic_matrix(h, scale)   # (H, H)
    dw = avgpool_matrix(w * scale, scale) @ bicubic_matrix(w, scale)   # (W, W)
    dT = np.kron(dh, dw).T.astype(np.float32)                          # (HW, HW)
    # TODO(synk): for large images (HW >~ 2K) switch to the separable dh/dw
    # factors instead of the dense Kronecker operator (VMEM scales as HW^2).
    ys, xs = np.divmod(np.arange(hw), w)
    rows = []
    for ky in range(3):
        for kx in range(3):
            dy, dx = ky - 1, kx - 1
            valid = ((ys + dy >= 0) & (ys + dy < h) &
                     (xs + dx >= 0) & (xs + dx < w)).astype(np.float32)
            rows.append(valid)
    m = np.stack(rows)                   # (9, HW)
    m = np.tile(m, (1, n_img))           # (9, n_img*HW) — packed-lane layout
    m = np.repeat(m, c, axis=0)          # (9C, L) — sublane-aligned row blocks
    return dT, m


# ----------------------------------------------------------------------------
# Wrapper
# ----------------------------------------------------------------------------
def high_forward(x_nchw, params, scale, *, mxu_dtype=jnp.bfloat16,
                 images_per_block=None):
    n, c, h, w = x_nchw.shape
    hw = h * w

    # How many images to pack into the lane axis of one grid step.
    if images_per_block is None:
        cap = max(1, 1024 // hw)         # keep per-step lane width <= ~1024
        images_per_block = 1
        for cand in range(min(n, cap), 0, -1):
            if n % cand == 0:
                images_per_block = cand
                break
    B = images_per_block
    assert n % B == 0, "batch must be divisible by images_per_block"
    nblk = n // B
    L = B * hw

    dT_np, m_np = _host_constants(c, h, w, scale, B)
    dT = jnp.asarray(dT_np, mxu_dtype)
    masks = jnp.asarray(m_np, jnp.float32)

    (w3, b3, wud, bud, wpa, bpa, wsca, bsca, wc1, bc1, w3l, b3l) = params

    def im2col_w(wt):   # (C_out, C_in, 3, 3) -> (C_out, 9*C_in), tap-major
        co, ci = wt.shape[0], wt.shape[1]
        return jnp.asarray(wt, mxu_dtype).transpose(0, 2, 3, 1).reshape(co, 9 * ci)

    def colb(b):        # (C,) -> (C, 1)  (channels on sublanes)
        return jnp.asarray(b, jnp.float32).reshape(-1, 1)

    # Pack batch into the lane axis: (N, C, HW) -> (N/B, C, B*HW)
    xf = x_nchw.astype(jnp.float32).reshape(nblk, B, c, hw)
    xf = jnp.transpose(xf, (0, 2, 1, 3)).reshape(nblk, c, L)

    args = (xf, masks, dT,
            im2col_w(w3), colb(b3),
            jnp.asarray(wud, jnp.float32), colb(bud),
            jnp.asarray(wpa, jnp.float32), colb(bpa),
            jnp.asarray(wsca, jnp.float32), colb(bsca),
            jnp.asarray(wc1, jnp.float32), colb(bc1),
            im2col_w(w3l), colb(b3l))

    def full(shp):
        return pl.BlockSpec(shp, lambda nn, _r=len(shp): (0,) * _r)

    in_specs = [
        pl.BlockSpec((1, c, L), lambda nn: (nn, 0, 0)),    # x, batch-packed lanes
        full((9 * c, L)),                                  # tap masks
        full((hw, hw)),                                    # composed up/down op
        full((c, 9 * c)), full((c, 1)),                    # conv_3
        full((c, c)), full((c, 1)),                        # up_down conv1x1
        full((c, c)), full((c, 1)),                        # PA conv1x1
        full((c, c)), full((c, 1)),                        # SCA conv1x1
        full((c, c)), full((c, 1)),                        # conv_1
        full((c, 9 * c)), full((c, 1)),                    # conv_3_last
    ]

    out_flat = pl.pallas_call(
        functools.partial(high_kernel, h, w, B),
        out_shape=jax.ShapeDtypeStruct((nblk, c, L), jnp.float32),
        grid_spec=pltpu.PrefetchScalarGridSpec(
            num_scalar_prefetch=0,
            grid=(nblk,),
            in_specs=in_specs,
            out_specs=pl.BlockSpec((1, c, L), lambda nn: (nn, 0, 0)),
            scratch_shapes=[pltpu.VMEM((9 * c, L), mxu_dtype)],   # im2col block
        ),
        compiler_params=pltpu.CompilerParams(
            dimension_semantics=("parallel",)),    # batch blocks are independent
    )(*args)

    out = out_flat.reshape(nblk, c, B, hw).transpose(0, 2, 1, 3)
    return out.reshape(n, c, h, w)


# ----------------------------------------------------------------------------
# Pure-JAX reference (un-fused formulation, XLA convs) for a sanity check
# ----------------------------------------------------------------------------
def ref_forward(x, params, scale):
    (w3, b3, wud, bud, wpa, bpa, wsca, bsca, wc1, bc1, w3l, b3l) = params
    n, c, h, w = x.shape
    sig = jax.nn.sigmoid

    def conv(v, wt, b, pad):
        out = jax.lax.conv_general_dilated(
            v, wt, window_strides=(1, 1), padding=((pad, pad), (pad, pad)),
            dimension_numbers=('NCHW', 'OIHW', 'NCHW'))
        return out + b.reshape(1, -1, 1, 1)

    out = conv(x, w3, b3, 1)

    Bh = jnp.asarray(bicubic_matrix(h, scale), jnp.float32)
    Bw = jnp.asarray(bicubic_matrix(w, scale), jnp.float32)
    up = jnp.einsum('oy,ncyx->ncox', Bh, x)
    up = jnp.einsum('px,ncox->ncop', Bw, up)

    ud = conv(up, wud.reshape(c, c, 1, 1), bud, 0)
    low = ud.reshape(n, c, h, scale, w, scale).mean(axis=(3, 5))   # AvgPool2d
    hi = x - low

    pa = hi * sig(conv(hi, wpa.reshape(c, c, 1, 1), bpa, 0))
    gap = hi.mean(axis=(2, 3), keepdims=True)
    sca = hi * conv(gap, wsca.reshape(c, c, 1, 1), bsca, 0)
    att = sig(conv(pa + sca, wc1.reshape(c, c, 1, 1), bc1, 0))
    return conv(att * out, w3l, b3l, 1)


# ----------------------------------------------------------------------------
if __name__ == "__main__":
    N, C, H, W = 2, 8, 16, 16
    SCALE = 2

    key = jax.random.PRNGKey(0)
    kx, *kw = jax.random.split(key, 13)
    x = jax.random.normal(kx, (N, C, H, W), dtype=jnp.float32)

    def u(k, shape, fan_in):
        b = 1.0 / math.sqrt(fan_in)
        return jax.random.uniform(k, shape, jnp.float32, -b, b)

    # Parameters in PyTorch layout:
    #  3x3 conv -> (C_out, C_in, 3, 3); 1x1 conv -> (C_out, C_in); bias -> (C,)
    w3   = u(kw[0],  (C, C, 3, 3), C * 9); b3   = u(kw[1],  (C,), C * 9)
    wud  = u(kw[2],  (C, C), C);           bud  = u(kw[3],  (C,), C)
    wpa  = u(kw[4],  (C, C), C);           bpa  = u(kw[5],  (C,), C)
    wsca = u(kw[6],  (C, C), C);           bsca = u(kw[7],  (C,), C)
    wc1  = u(kw[8],  (C, C), C);           bc1  = u(kw[9],  (C,), C)
    w3l  = u(kw[10], (C, C, 3, 3), C * 9); b3l  = u(kw[11], (C,), C * 9)
    params = (w3, b3, wud, bud, wpa, bpa, wsca, bsca, wc1, bc1, w3l, b3l)

    # Default (perf) path: bf16 matmul operands, f32 accumulate, jitted wrapper
    # so the host constants / reshaped weights are baked in once.
    fwd = jax.jit(lambda xx: high_forward(xx, params, SCALE))
    out_bf16 = jax.block_until_ready(fwd(x))

    # Full-f32 path for a tight correctness check.
    out_f32 = jax.block_until_ready(
        high_forward(x, params, SCALE, mxu_dtype=jnp.float32))

    with jax.default_matmul_precision("highest"):
        ref_nchw = ref_forward(x.astype(jnp.float32), params, SCALE)

    err_f32 = float(jnp.max(jnp.abs(out_f32 - ref_nchw)))
    err_bf16 = float(jnp.max(jnp.abs(out_bf16 - ref_nchw)))
    assert out_bf16.shape == (N, C, H, W)
    assert bool(jnp.all(jnp.isfinite(out_bf16)))
    assert bool(jnp.all(jnp.isfinite(out_f32)))
    assert err_f32 < 1e-2, f"f32 path max abs err {err_f32}"
    assert err_bf16 < 5e-2, f"bf16 path max abs err {err_bf16}"
    print("KERNEL_OK")
</pallas_src>

<mosaic_0001>
module attributes {stable_mosaic.version = 11 : i64} {
  func.func @high_kernel(%arg0: i32, %arg1: memref<1x8x512xf32, #tpu.memory_space<vmem>>, %arg2: memref<72x512xf32, #tpu.memory_space<vmem>>, %arg3: memref<256x256xbf16, #tpu.memory_space<vmem>>, %arg4: memref<8x72xbf16, #tpu.memory_space<vmem>>, %arg5: memref<8x1xf32, #tpu.memory_space<vmem>>, %arg6: memref<8x8xf32, #tpu.memory_space<vmem>>, %arg7: memref<8x1xf32, #tpu.memory_space<vmem>>, %arg8: memref<8x8xf32, #tpu.memory_space<vmem>>, %arg9: memref<8x1xf32, #tpu.memory_space<vmem>>, %arg10: memref<8x8xf32, #tpu.memory_space<vmem>>, %arg11: memref<8x1xf32, #tpu.memory_space<vmem>>, %arg12: memref<8x8xf32, #tpu.memory_space<vmem>>, %arg13: memref<8x1xf32, #tpu.memory_space<vmem>>, %arg14: memref<8x72xbf16, #tpu.memory_space<vmem>>, %arg15: memref<8x1xf32, #tpu.memory_space<vmem>>, %arg16: memref<1x8x512xf32, #tpu.memory_space<vmem>>, %arg17: memref<72x512xbf16, #tpu.memory_space<vmem>>) attributes {dimension_semantics = [#tpu.dimension_semantics<parallel>], iteration_bounds = array<i64: 1>, scalar_prefetch = 0 : i64, scratch_operands = 1 : i64, tpu.core_type = #tpu.core_type<tc>, window_params = [{transform_indices = @transform_0, window_bounds = array<i64: 1, 8, 512>}, {pipeline_mode = #tpu.pipeline_mode<synchronous>, transform_indices = @transform_1, window_bounds = array<i64: 72, 512>}, {pipeline_mode = #tpu.pipeline_mode<synchronous>, transform_indices = @transform_2, window_bounds = array<i64: 256, 256>}, {pipeline_mode = #tpu.pipeline_mode<synchronous>, transform_indices = @transform_3, window_bounds = array<i64: 8, 72>}, {pipeline_mode = #tpu.pipeline_mode<synchronous>, transform_indices = @transform_4, window_bounds = array<i64: 8, 1>}, {pipeline_mode = #tpu.pipeline_mode<synchronous>, transform_indices = @transform_5, window_bounds = array<i64: 8, 8>}, {pipeline_mode = #tpu.pipeline_mode<synchronous>, transform_indices = @transform_6, window_bounds = array<i64: 8, 1>}, {pipeline_mode = #tpu.pipeline_mode<synchronous>, transform_indices = @transform_7, window_bounds = array<i64: 8, 8>}, {pipeline_mode = #tpu.pipeline_mode<synchronous>, transform_indices = @transform_8, window_bounds = array<i64: 8, 1>}, {pipeline_mode = #tpu.pipeline_mode<synchronous>, transform_indices = @transform_9, window_bounds = array<i64: 8, 8>}, {pipeline_mode = #tpu.pipeline_mode<synchronous>, transform_indices = @transform_10, window_bounds = array<i64: 8, 1>}, {pipeline_mode = #tpu.pipeline_mode<synchronous>, transform_indices = @transform_11, window_bounds = array<i64: 8, 8>}, {pipeline_mode = #tpu.pipeline_mode<synchronous>, transform_indices = @transform_12, window_bounds = array<i64: 8, 1>}, {pipeline_mode = #tpu.pipeline_mode<synchronous>, transform_indices = @transform_13, window_bounds = array<i64: 8, 72>}, {pipeline_mode = #tpu.pipeline_mode<synchronous>, transform_indices = @transform_14, window_bounds = array<i64: 8, 1>}, {transform_indices = @transform_15, window_bounds = array<i64: 1, 8, 512>}]} {
    %c0 = arith.constant 0 : index
    %c0_0 = arith.constant 0 : index
    %c0_1 = arith.constant 0 : index
    %0 = vector.load %arg1[%c0, %c0_0, %c0_1] : memref<1x8x512xf32, #tpu.memory_space<vmem>>, vector<1x8x512xf32>
    %1 = vector.shape_cast %0 : vector<1x8x512xf32> to vector<8x512xf32>
    %c17_i32 = arith.constant 17 : i32
    %2 = tpu.dynamic_rotate %1 by %c17_i32 dim 1 : vector<8x512xf32>, i32 -> vector<8x512xf32>
    %c0_2 = arith.constant 0 : index
    %c0_3 = arith.constant 0 : index
    %3 = vector.load %arg2[%c0_2, %c0_3] : memref<72x512xf32, #tpu.memory_space<vmem>>, vector<8x512xf32>
    %4 = arith.mulf %2, %3 : vector<8x512xf32>
    %5 = arith.truncf %4 : vector<8x512xf32> to vector<8x512xbf16>
    %c0_4 = arith.constant 0 : index
    %c0_5 = arith.constant 0 : index
    %6 = vector.load %arg17[%c0_4, %c0_5] : memref<72x512xbf16, #tpu.memory_space<vmem>>, vector<8x512xbf16>
    tpu.vector_store %arg17[%c0_4, %c0_5], %5 {strides = array<i32>} : memref<72x512xbf16, #tpu.memory_space<vmem>>, vector<8x512xbf16>,
    %c16_i32 = arith.constant 16 : i32
    %7 = tpu.dynamic_rotate %1 by %c16_i32 dim 1 : vector<8x512xf32>, i32 -> vector<8x512xf32>
    %c8 = arith.constant 8 : index
    %c0_6 = arith.constant 0 : index
    %8 = vector.load %arg2[%c8, %c0_6] : memref<72x512xf32, #tpu.memory_space<vmem>>, vector<8x512xf32>
    %9 = arith.mulf %7, %8 : vector<8x512xf32>
    %10 = arith.truncf %9 : vector<8x512xf32> to vector<8x512xbf16>
    %c8_7 = arith.constant 8 : index
    %c0_8 = arith.constant 0 : index
    %11 = vector.load %arg17[%c8_7, %c0_8] : memref<72x512xbf16, #tpu.memory_space<vmem>>, vector<8x512xbf16>
    tpu.vector_store %arg17[%c8_7, %c0_8], %10 {strides = array<i32>} : memref<72x512xbf16, #tpu.memory_space<vmem>>, vector<8x512xbf16>,
    %c15_i32 = arith.constant 15 : i32
    %12 = tpu.dynamic_rotate %1 by %c15_i32 dim 1 : vector<8x512xf32>, i32 -> vector<8x512xf32>
    %c16 = arith.constant 16 : index
    %c0_9 = arith.constant 0 : index
    %13 = vector.load %arg2[%c16, %c0_9] : memref<72x512xf32, #tpu.memory_space<vmem>>, vector<8x512xf32>
    %14 = arith.mulf %12, %13 : vector<8x512xf32>
    %15 = arith.truncf %14 : vector<8x512xf32> to vector<8x512xbf16>
    %c16_10 = arith.constant 16 : index
    %c0_11 = arith.constant 0 : index
    %16 = vector.load %arg17[%c16_10, %c0_11] : memref<72x512xbf16, #tpu.memory_space<vmem>>, vector<8x512xbf16>
    tpu.vector_store %arg17[%c16_10, %c0_11], %15 {strides = array<i32>} : memref<72x512xbf16, #tpu.memory_space<vmem>>, vector<8x512xbf16>,
    %c1_i32 = arith.constant 1 : i32
    %17 = tpu.dynamic_rotate %1 by %c1_i32 dim 1 : vector<8x512xf32>, i32 -> vector<8x512xf32>
    %c24 = arith.constant 24 : index
    %c0_12 = arith.constant 0 : index
    %18 = vector.load %arg2[%c24, %c0_12] : memref<72x512xf32, #tpu.memory_space<vmem>>, vector<8x512xf32>
    %19 = arith.mulf %17, %18 : vector<8x512xf32>
    %20 = arith.truncf %19 : vector<8x512xf32> to vector<8x512xbf16>
    %c24_13 = arith.constant 24 : index
    %c0_14 = arith.constant 0 : index
    %21 = vector.load %arg17[%c24_13, %c0_14] : memref<72x512xbf16, #tpu.memory_space<vmem>>, vector<8x512xbf16>
    tpu.vector_store %arg17[%c24_13, %c0_14], %20 {strides = array<i32>} : memref<72x512xbf16, #tpu.memory_space<vmem>>, vector<8x512xbf16>,
    %22 = arith.truncf %1 : vector<8x512xf32> to vector<8x512xbf16>
    %c32 = arith.constant 32 : index
    %c0_15 = arith.constant 0 : index
    %23 = vector.load %arg17[%c32, %c0_15] : memref<72x512xbf16, #tpu.memory_space<vmem>>, vector<8x512xbf16>
    tpu.vector_store %arg17[%c32, %c0_15], %22 {strides = array<i32>} : memref<72x512xbf16, #tpu.memory_space<vmem>>, vector<8x512xbf16>,
    %c511_i32 = arith.constant 511 : i32
    %24 = tpu.dynamic_rotate %1 by %c511_i32 dim 1 : vector<8x512xf32>, i32 -> vector<8x512xf32>
    %c40 = arith.constant 40 : index
    %c0_16 = arith.constant 0 : index
    %25 = vector.load %arg2[%c40, %c0_16] : memref<72x512xf32, #tpu.memory_space<vmem>>, vector<8x512xf32>
    %26 = arith.mulf %24, %25 : vector<8x512xf32>
    %27 = arith.truncf %26 : vector<8x512xf32> to vector<8x512xbf16>
    %c40_17 = arith.constant 40 : index
    %c0_18 = arith.constant 0 : index
    %28 = vector.load %arg17[%c40_17, %c0_18] : memref<72x512xbf16, #tpu.memory_space<vmem>>, vector<8x512xbf16>
    tpu.vector_store %arg17[%c40_17, %c0_18], %27 {strides = array<i32>} : memref<72x512xbf16, #tpu.memory_space<vmem>>, vector<8x512xbf16>,
    %c497_i32 = arith.constant 497 : i32
    %29 = tpu.dynamic_rotate %1 by %c497_i32 dim 1 : vector<8x512xf32>, i32 -> vector<8x512xf32>
    %c48 = arith.constant 48 : index
    %c0_19 = arith.constant 0 : index
    %30 = vector.load %arg2[%c48, %c0_19] : memref<72x512xf32, #tpu.memory_space<vmem>>, vector<8x512xf32>
    %31 = arith.mulf %29, %30 : vector<8x512xf32>
    %32 = arith.truncf %31 : vector<8x512xf32> to vector<8x512xbf16>
    %c48_20 = arith.constant 48 : index
    %c0_21 = arith.constant 0 : index
    %33 = vector.load %arg17[%c48_20, %c0_21] : memref<72x512xbf16, #tpu.memory_space<vmem>>, vector<8x512xbf16>
    tpu.vector_store %arg17[%c48_20, %c0_21], %32 {strides = array<i32>} : memref<72x512xbf16, #tpu.memory_space<vmem>>, vector<8x512xbf16>,
    %c496_i32 = arith.constant 496 : i32
    %34 = tpu.dynamic_rotate %1 by %c496_i32 dim 1 : vector<8x512xf32>, i32 -> vector<8x512xf32>
    %c56 = arith.constant 56 : index
    %c0_22 = arith.constant 0 : index
    %35 = vector.load %arg2[%c56, %c0_22] : memref<72x512xf32, #tpu.memory_space<vmem>>, vector<8x512xf32>
    %36 = arith.mulf %34, %35 : vector<8x512xf32>
    %37 = arith.truncf %36 : vector<8x512xf32> to vector<8x512xbf16>
    %c56_23 = arith.constant 56 : index
    %c0_24 = arith.constant 0 : index
    %38 = vector.load %arg17[%c56_23, %c0_24] : memref<72x512xbf16, #tpu.memory_space<vmem>>, vector<8x512xbf16>
    tpu.vector_store %arg17[%c56_23, %c0_24], %37 {strides = array<i32>} : memref<72x512xbf16, #tpu.memory_space<vmem>>, vector<8x512xbf16>,
    %c495_i32 = arith.constant 495 : i32
    %39 = tpu.dynamic_rotate %1 by %c495_i32 dim 1 : vector<8x512xf32>, i32 -> vector<8x512xf32>
    %c64 = arith.constant 64 : index
    %c0_25 = arith.constant 0 : index
    %40 = vector.load %arg2[%c64, %c0_25] : memref<72x512xf32, #tpu.memory_space<vmem>>, vector<8x512xf32>
    %41 = arith.mulf %39, %40 : vector<8x512xf32>
    %42 = arith.truncf %41 : vector<8x512xf32> to vector<8x512xbf16>
    %c64_26 = arith.constant 64 : index
    %c0_27 = arith.constant 0 : index
    %43 = vector.load %arg17[%c64_26, %c0_27] : memref<72x512xbf16, #tpu.memory_space<vmem>>, vector<8x512xbf16>
    tpu.vector_store %arg17[%c64_26, %c0_27], %42 {strides = array<i32>} : memref<72x512xbf16, #tpu.memory_space<vmem>>, vector<8x512xbf16>,
    %c0_28 = arith.constant 0 : index
    %c0_29 = arith.constant 0 : index
    %44 = vector.load %arg4[%c0_28, %c0_29] : memref<8x72xbf16, #tpu.memory_space<vmem>>, vector<8x72xbf16>
    %c0_30 = arith.constant 0 : index
    %c0_31 = arith.constant 0 : index
    %45 = vector.load %arg17[%c0_30, %c0_31] : memref<72x512xbf16, #tpu.memory_space<vmem>>, vector<72x512xbf16>
    %cst = arith.constant dense<0.000000e+00> : vector<8x512xf32>
    %46 = tpu.matmul %44, %45, %cst {dimension_numbers = #tpu.dot_dimension_numbers<[1], [0], [0], [1], [0, 0, 1, 1], [], []>} : vector<8x72xbf16>, vector<72x512xbf16>, vector<8x512xf32> -> vector<8x512xf32>
    %c0_32 = arith.constant 0 : index
    %c0_33 = arith.constant 0 : index
    %47 = vector.load %arg5[%c0_32, %c0_33] : memref<8x1xf32, #tpu.memory_space<vmem>>, vector<8x1xf32>
    %48 = vector.broadcast %47 : vector<8x1xf32> to vector<8x512xf32>
    %49 = arith.addf %46, %48 : vector<8x512xf32>
    %50 = arith.truncf %1 : vector<8x512xf32> to vector<8x512xbf16>
    %51 = vector.extract_strided_slice %50 {offsets = [0, 0], sizes = [8, 256], strides = [1, 1]} : vector<8x512xbf16> to vector<8x256xbf16>
    %c0_34 = arith.constant 0 : index
    %c0_35 = arith.constant 0 : index
    %52 = vector.load %arg3[%c0_34, %c0_35] : memref<256x256xbf16, #tpu.memory_space<vmem>>, vector<256x256xbf16>
    %cst_36 = arith.constant dense<0.000000e+00> : vector<8x256xf32>
    %53 = tpu.matmul %51, %52, %cst_36 {dimension_numbers = #tpu.dot_dimension_numbers<[1], [0], [0], [1], [0, 0, 1, 1], [], []>} : vector<8x256xbf16>, vector<256x256xbf16>, vector<8x256xf32> -> vector<8x256xf32>
    %54 = vector.extract_strided_slice %50 {offsets = [0, 256], sizes = [8, 256], strides = [1, 1]} : vector<8x512xbf16> to vector<8x256xbf16>
    %c0_37 = arith.constant 0 : index
    %c0_38 = arith.constant 0 : index
    %55 = vector.load %arg3[%c0_37, %c0_38] : memref<256x256xbf16, #tpu.memory_space<vmem>>, vector<256x256xbf16>
    %cst_39 = arith.constant dense<0.000000e+00> : vector<8x256xf32>
    %56 = tpu.matmul %54, %55, %cst_39 {dimension_numbers = #tpu.dot_dimension_numbers<[1], [0], [0], [1], [0, 0, 1, 1], [], []>} : vector<8x256xbf16>, vector<256x256xbf16>, vector<8x256xf32> -> vector<8x256xf32>
    %57 = tpu.concatenate %53, %56 in 1 : vector<8x256xf32>, vector<8x256xf32> -> vector<8x512xf32>
    %c0_40 = arith.constant 0 : index
    %c0_41 = arith.constant 0 : index
    %58 = vector.load %arg6[%c0_40, %c0_41] : memref<8x8xf32, #tpu.memory_space<vmem>>, vector<8x8xf32>
    %cst_42 = arith.constant dense<0.000000e+00> : vector<8x512xf32>
    %59 = tpu.matmul %58, %57, %cst_42 {dimension_numbers = #tpu.dot_dimension_numbers<[1], [0], [0], [1], [0, 0, 1, 1], [], []>} : vector<8x8xf32>, vector<8x512xf32>, vector<8x512xf32> -> vector<8x512xf32>
    %c0_43 = arith.constant 0 : index
    %c0_44 = arith.constant 0 : index
    %60 = vector.load %arg7[%c0_43, %c0_44] : memref<8x1xf32, #tpu.memory_space<vmem>>, vector<8x1xf32>
    %61 = vector.broadcast %60 : vector<8x1xf32> to vector<8x512xf32>
    %62 = arith.addf %59, %61 : vector<8x512xf32>
    %63 = arith.subf %1, %62 : vector<8x512xf32>
    %c0_45 = arith.constant 0 : index
    %c0_46 = arith.constant 0 : index
    %64 = vector.load %arg8[%c0_45, %c0_46] : memref<8x8xf32, #tpu.memory_space<vmem>>, vector<8x8xf32>
    %cst_47 = arith.constant dense<0.000000e+00> : vector<8x512xf32>
    %65 = tpu.matmul %64, %63, %cst_47 {dimension_numbers = #tpu.dot_dimension_numbers<[1], [0], [0], [1], [0, 0, 1, 1], [], []>} : vector<8x8xf32>, vector<8x512xf32>, vector<8x512xf32> -> vector<8x512xf32>
    %c0_48 = arith.constant 0 : index
    %c0_49 = arith.constant 0 : index
    %66 = vector.load %arg9[%c0_48, %c0_49] : memref<8x1xf32, #tpu.memory_space<vmem>>, vector<8x1xf32>
    %67 = vector.broadcast %66 : vector<8x1xf32> to vector<8x512xf32>
    %68 = arith.addf %65, %67 : vector<8x512xf32>
    %cst_50 = arith.constant 0.000000e+00 : f32
    %69 = vector.broadcast %cst_50 : f32 to vector<8x512xf32>
    %70 = arith.subf %69, %68 : vector<8x512xf32>
    %71 = math.exp %70 : vector<8x512xf32>
    %cst_51 = arith.constant 1.000000e+00 : f32
    %72 = vector.broadcast %cst_51 : f32 to vector<8x512xf32>
    %73 = arith.addf %72, %71 : vector<8x512xf32>
    %74 = tpu.reciprocal %73 {approx = true} : vector<8x512xf32> -> vector<8x512xf32>
    %75 = arith.mulf %63, %74 : vector<8x512xf32>
    %76 = vector.extract_strided_slice %63 {offsets = [0, 0], sizes = [8, 256], strides = [1, 1]} : vector<8x512xf32> to vector<8x256xf32>
    %cst_52 = arith.constant dense<0.000000e+00> : vector<8xf32>
    %77 = vector.multi_reduction <add>, %76, %cst_52 [1] : vector<8x256xf32> to vector<8xf32>
    %78 = vector.shape_cast %77 : vector<8xf32> to vector<8x1xf32>
    %cst_53 = arith.constant 2.560000e+02 : f32
    %79 = vector.broadcast %cst_53 : f32 to vector<8x1xf32>
    %80 = arith.divf %78, %79 : vector<8x1xf32>
    %81 = vector.shape_cast %80 : vector<8x1xf32> to vector<8x1xf32>
    %82 = vector.broadcast %81 : vector<8x1xf32> to vector<8x8xf32>
    %c0_54 = arith.constant 0 : index
    %c0_55 = arith.constant 0 : index
    %83 = vector.load %arg10[%c0_54, %c0_55] : memref<8x8xf32, #tpu.memory_space<vmem>>, vector<8x8xf32>
    %cst_56 = arith.constant dense<0.000000e+00> : vector<8x8xf32>
    %84 = tpu.matmul %83, %82, %cst_56 {dimension_numbers = #tpu.dot_dimension_numbers<[1], [0], [0], [1], [0, 0, 1, 1], [], []>} : vector<8x8xf32>, vector<8x8xf32>, vector<8x8xf32> -> vector<8x8xf32>
    %85 = vector.extract_strided_slice %84 {offsets = [0, 0], sizes = [8, 1], strides = [1, 1]} : vector<8x8xf32> to vector<8x1xf32>
    %c0_57 = arith.constant 0 : index
    %c0_58 = arith.constant 0 : index
    %86 = vector.load %arg11[%c0_57, %c0_58] : memref<8x1xf32, #tpu.memory_space<vmem>>, vector<8x1xf32>
    %87 = arith.addf %85, %86 : vector<8x1xf32>
    %88 = vector.broadcast %87 : vector<8x1xf32> to vector<8x256xf32>
    %89 = arith.mulf %76, %88 : vector<8x256xf32>
    %90 = vector.extract_strided_slice %63 {offsets = [0, 256], sizes = [8, 256], strides = [1, 1]} : vector<8x512xf32> to vector<8x256xf32>
    %cst_59 = arith.constant dense<0.000000e+00> : vector<8xf32>
    %91 = vector.multi_reduction <add>, %90, %cst_59 [1] : vector<8x256xf32> to vector<8xf32>
    %92 = vector.shape_cast %91 : vector<8xf32> to vector<8x1xf32>
    %cst_60 = arith.constant 2.560000e+02 : f32
    %93 = vector.broadcast %cst_60 : f32 to vector<8x1xf32>
    %94 = arith.divf %92, %93 : vector<8x1xf32>
    %95 = vector.shape_cast %94 : vector<8x1xf32> to vector<8x1xf32>
    %96 = vector.broadcast %95 : vector<8x1xf32> to vector<8x8xf32>
    %c0_61 = arith.constant 0 : index
    %c0_62 = arith.constant 0 : index
    %97 = vector.load %arg10[%c0_61, %c0_62] : memref<8x8xf32, #tpu.memory_space<vmem>>, vector<8x8xf32>
    %cst_63 = arith.constant dense<0.000000e+00> : vector<8x8xf32>
    %98 = tpu.matmul %97, %96, %cst_63 {dimension_numbers = #tpu.dot_dimension_numbers<[1], [0], [0], [1], [0, 0, 1, 1], [], []>} : vector<8x8xf32>, vector<8x8xf32>, vector<8x8xf32> -> vector<8x8xf32>
    %99 = vector.extract_strided_slice %98 {offsets = [0, 0], sizes = [8, 1], strides = [1, 1]} : vector<8x8xf32> to vector<8x1xf32>
    %c0_64 = arith.constant 0 : index
    %c0_65 = arith.constant 0 : index
    %100 = vector.load %arg11[%c0_64, %c0_65] : memref<8x1xf32, #tpu.memory_space<vmem>>, vector<8x1xf32>
    %101 = arith.addf %99, %100 : vector<8x1xf32>
    %102 = vector.broadcast %101 : vector<8x1xf32> to vector<8x256xf32>
    %103 = arith.mulf %90, %102 : vector<8x256xf32>
    %104 = tpu.concatenate %89, %103 in 1 : vector<8x256xf32>, vector<8x256xf32> -> vector<8x512xf32>
    %c0_66 = arith.constant 0 : index
    %c0_67 = arith.constant 0 : index
    %105 = vector.load %arg12[%c0_66, %c0_67] : memref<8x8xf32, #tpu.memory_space<vmem>>, vector<8x8xf32>
    %106 = arith.addf %75, %104 : vector<8x512xf32>
    %cst_68 = arith.constant dense<0.000000e+00> : vector<8x512xf32>
    %107 = tpu.matmul %105, %106, %cst_68 {dimension_numbers = #tpu.dot_dimension_numbers<[1], [0], [0], [1], [0, 0, 1, 1], [], []>} : vector<8x8xf32>, vector<8x512xf32>, vector<8x512xf32> -> vector<8x512xf32>
    %c0_69 = arith.constant 0 : index
    %c0_70 = arith.constant 0 : index
    %108 = vector.load %arg13[%c0_69, %c0_70] : memref<8x1xf32, #tpu.memory_space<vmem>>, vector<8x1xf32>
    %109 = vector.broadcast %108 : vector<8x1xf32> to vector<8x512xf32>
    %110 = arith.addf %107, %109 : vector<8x512xf32>
    %cst_71 = arith.constant 0.000000e+00 : f32
    %111 = vector.broadcast %cst_71 : f32 to vector<8x512xf32>
    %112 = arith.subf %111, %110 : vector<8x512xf32>
    %113 = math.exp %112 : vector<8x512xf32>
    %cst_72 = arith.constant 1.000000e+00 : f32
    %114 = vector.broadcast %cst_72 : f32 to vector<8x512xf32>
    %115 = arith.addf %114, %113 : vector<8x512xf32>
    %116 = tpu.reciprocal %115 {approx = true} : vector<8x512xf32> -> vector<8x512xf32>
    %117 = arith.mulf %116, %49 : vector<8x512xf32>
    %c17_i32_73 = arith.constant 17 : i32
    %118 = tpu.dynamic_rotate %117 by %c17_i32_73 dim 1 : vector<8x512xf32>, i32 -> vector<8x512xf32>
    %c0_74 = arith.constant 0 : index
    %c0_75 = arith.constant 0 : index
    %119 = vector.load %arg2[%c0_74, %c0_75] : memref<72x512xf32, #tpu.memory_space<vmem>>, vector<8x512xf32>
    %120 = arith.mulf %118, %119 : vector<8x512xf32>
    %121 = arith.truncf %120 : vector<8x512xf32> to vector<8x512xbf16>
    %c0_76 = arith.constant 0 : index
    %c0_77 = arith.constant 0 : index
    %122 = vector.load %arg17[%c0_76, %c0_77] : memref<72x512xbf16, #tpu.memory_space<vmem>>, vector<8x512xbf16>
    tpu.vector_store %arg17[%c0_76, %c0_77], %121 {strides = array<i32>} : memref<72x512xbf16, #tpu.memory_space<vmem>>, vector<8x512xbf16>,
    %c16_i32_78 = arith.constant 16 : i32
    %123 = tpu.dynamic_rotate %117 by %c16_i32_78 dim 1 : vector<8x512xf32>, i32 -> vector<8x512xf32>
    %c8_79 = arith.constant 8 : index
    %c0_80 = arith.constant 0 : index
    %124 = vector.load %arg2[%c8_79, %c0_80] : memref<72x512xf32, #tpu.memory_space<vmem>>, vector<8x512xf32>
    %125 = arith.mulf %123, %124 : vector<8x512xf32>
    %126 = arith.truncf %125 : vector<8x512xf32> to vector<8x512xbf16>
    %c8_81 = arith.constant 8 : index
    %c0_82 = arith.constant 0 : index
    %127 = vector.load %arg17[%c8_81, %c0_82] : memref<72x512xbf16, #tpu.memory_space<vmem>>, vector<8x512xbf16>
    tpu.vector_store %arg17[%c8_81, %c0_82], %126 {strides = array<i32>} : memref<72x512xbf16, #tpu.memory_space<vmem>>, vector<8x512xbf16>,
    %c15_i32_83 = arith.constant 15 : i32
    %128 = tpu.dynamic_rotate %117 by %c15_i32_83 dim 1 : vector<8x512xf32>, i32 -> vector<8x512xf32>
    %c16_84 = arith.constant 16 : index
    %c0_85 = arith.constant 0 : index
    %129 = vector.load %arg2[%c16_84, %c0_85] : memref<72x512xf32, #tpu.memory_space<vmem>>, vector<8x512xf32>
    %130 = arith.mulf %128, %129 : vector<8x512xf32>
    %131 = arith.truncf %130 : vector<8x512xf32> to vector<8x512xbf16>
    %c16_86 = arith.constant 16 : index
    %c0_87 = arith.constant 0 : index
    %132 = vector.load %arg17[%c16_86, %c0_87] : memref<72x512xbf16, #tpu.memory_space<vmem>>, vector<8x512xbf16>
    tpu.vector_store %arg17[%c16_86, %c0_87], %131 {strides = array<i32>} : memref<72x512xbf16, #tpu.memory_space<vmem>>, vector<8x512xbf16>,
    %c1_i32_88 = arith.constant 1 : i32
    %133 = tpu.dynamic_rotate %117 by %c1_i32_88 dim 1 : vector<8x512xf32>, i32 -> vector<8x512xf32>
    %c24_89 = arith.constant 24 : index
    %c0_90 = arith.constant 0 : index
    %134 = vector.load %arg2[%c24_89, %c0_90] : memref<72x512xf32, #tpu.memory_space<vmem>>, vector<8x512xf32>
    %135 = arith.mulf %133, %134 : vector<8x512xf32>
    %136 = arith.truncf %135 : vector<8x512xf32> to vector<8x512xbf16>
    %c24_91 = arith.constant 24 : index
    %c0_92 = arith.constant 0 : index
    %137 = vector.load %arg17[%c24_91, %c0_92] : memref<72x512xbf16, #tpu.memory_space<vmem>>, vector<8x512xbf16>
    tpu.vector_store %arg17[%c24_91, %c0_92], %136 {strides = array<i32>} : memref<72x512xbf16, #tpu.memory_space<vmem>>, vector<8x512xbf16>,
    %138 = arith.truncf %117 : vector<8x512xf32> to vector<8x512xbf16>
    %c32_93 = arith.constant 32 : index
    %c0_94 = arith.constant 0 : index
    %139 = vector.load %arg17[%c32_93, %c0_94] : memref<72x512xbf16, #tpu.memory_space<vmem>>, vector<8x512xbf16>
    tpu.vector_store %arg17[%c32_93, %c0_94], %138 {strides = array<i32>} : memref<72x512xbf16, #tpu.memory_space<vmem>>, vector<8x512xbf16>,
    %c511_i32_95 = arith.constant 511 : i32
    %140 = tpu.dynamic_rotate %117 by %c511_i32_95 dim 1 : vector<8x512xf32>, i32 -> vector<8x512xf32>
    %c40_96 = arith.constant 40 : index
    %c0_97 = arith.constant 0 : index
    %141 = vector.load %arg2[%c40_96, %c0_97] : memref<72x512xf32, #tpu.memory_space<vmem>>, vector<8x512xf32>
    %142 = arith.mulf %140, %141 : vector<8x512xf32>
    %143 = arith.truncf %142 : vector<8x512xf32> to vector<8x512xbf16>
    %c40_98 = arith.constant 40 : index
    %c0_99 = arith.constant 0 : index
    %144 = vector.load %arg17[%c40_98, %c0_99] : memref<72x512xbf16, #tpu.memory_space<vmem>>, vector<8x512xbf16>
    tpu.vector_store %arg17[%c40_98, %c0_99], %143 {strides = array<i32>} : memref<72x512xbf16, #tpu.memory_space<vmem>>, vector<8x512xbf16>,
    %c497_i32_100 = arith.constant 497 : i32
    %145 = tpu.dynamic_rotate %117 by %c497_i32_100 dim 1 : vector<8x512xf32>, i32 -> vector<8x512xf32>
    %c48_101 = arith.constant 48 : index
    %c0_102 = arith.constant 0 : index
    %146 = vector.load %arg2[%c48_101, %c0_102] : memref<72x512xf32, #tpu.memory_space<vmem>>, vector<8x512xf32>
    %147 = arith.mulf %145, %146 : vector<8x512xf32>
    %148 = arith.truncf %147 : vector<8x512xf32> to vector<8x512xbf16>
    %c48_103 = arith.constant 48 : index
    %c0_104 = arith.constant 0 : index
    %149 = vector.load %arg17[%c48_103, %c0_104] : memref<72x512xbf16, #tpu.memory_space<vmem>>, vector<8x512xbf16>
    tpu.vector_store %arg17[%c48_103, %c0_104], %148 {strides = array<i32>} : memref<72x512xbf16, #tpu.memory_space<vmem>>, vector<8x512xbf16>,
    %c496_i32_105 = arith.constant 496 : i32
    %150 = tpu.dynamic_rotate %117 by %c496_i32_105 dim 1 : vector<8x512xf32>, i32 -> vector<8x512xf32>
    %c56_106 = arith.constant 56 : index
    %c0_107 = arith.constant 0 : index
    %151 = vector.load %arg2[%c56_106, %c0_107] : memref<72x512xf32, #tpu.memory_space<vmem>>, vector<8x512xf32>
    %152 = arith.mulf %150, %151 : vector<8x512xf32>
    %153 = arith.truncf %152 : vector<8x512xf32> to vector<8x512xbf16>
    %c56_108 = arith.constant 56 : index
    %c0_109 = arith.constant 0 : index
    %154 = vector.load %arg17[%c56_108, %c0_109] : memref<72x512xbf16, #tpu.memory_space<vmem>>, vector<8x512xbf16>
    tpu.vector_store %arg17[%c56_108, %c0_109], %153 {strides = array<i32>} : memref<72x512xbf16, #tpu.memory_space<vmem>>, vector<8x512xbf16>,
    %c495_i32_110 = arith.constant 495 : i32
    %155 = tpu.dynamic_rotate %117 by %c495_i32_110 dim 1 : vector<8x512xf32>, i32 -> vector<8x512xf32>
    %c64_111 = arith.constant 64 : index
    %c0_112 = arith.constant 0 : index
    %156 = vector.load %arg2[%c64_111, %c0_112] : memref<72x512xf32, #tpu.memory_space<vmem>>, vector<8x512xf32>
    %157 = arith.mulf %155, %156 : vector<8x512xf32>
    %158 = arith.truncf %157 : vector<8x512xf32> to vector<8x512xbf16>
    %c64_113 = arith.constant 64 : index
    %c0_114 = arith.constant 0 : index
    %159 = vector.load %arg17[%c64_113, %c0_114] : memref<72x512xbf16, #tpu.memory_space<vmem>>, vector<8x512xbf16>
    tpu.vector_store %arg17[%c64_113, %c0_114], %158 {strides = array<i32>} : memref<72x512xbf16, #tpu.memory_space<vmem>>, vector<8x512xbf16>,
    %c0_115 = arith.constant 0 : index
    %c0_116 = arith.constant 0 : index
    %160 = vector.load %arg14[%c0_115, %c0_116] : memref<8x72xbf16, #tpu.memory_space<vmem>>, vector<8x72xbf16>
    %c0_117 = arith.constant 0 : index
    %c0_118 = arith.constant 0 : index
    %161 = vector.load %arg17[%c0_117, %c0_118] : memref<72x512xbf16, #tpu.memory_space<vmem>>, vector<72x512xbf16>
    %cst_119 = arith.constant dense<0.000000e+00> : vector<8x512xf32>
    %162 = tpu.matmul %160, %161, %cst_119 {dimension_numbers = #tpu.dot_dimension_numbers<[1], [0], [0], [1], [0, 0, 1, 1], [], []>} : vector<8x72xbf16>, vector<72x512xbf16>, vector<8x512xf32> -> vector<8x512xf32>
    %c0_120 = arith.constant 0 : index
    %c0_121 = arith.constant 0 : index
    %163 = vector.load %arg15[%c0_120, %c0_121] : memref<8x1xf32, #tpu.memory_space<vmem>>, vector<8x1xf32>
    %164 = vector.broadcast %163 : vector<8x1xf32> to vector<8x512xf32>
    %165 = arith.addf %162, %164 : vector<8x512xf32>
    %c0_122 = arith.constant 0 : index
    %c0_123 = arith.constant 0 : index
    %c0_124 = arith.constant 0 : index
    %166 = vector.load %arg16[%c0_122, %c0_123, %c0_124] : memref<1x8x512xf32, #tpu.memory_space<vmem>>, vector<1x8x512xf32>
    %167 = vector.shape_cast %166 : vector<1x8x512xf32> to vector<8x512xf32>
    %168 = vector.shape_cast %165 : vector<8x512xf32> to vector<1x8x512xf32>
    tpu.vector_store %arg16[%c0_122, %c0_123, %c0_124], %168 {strides = array<i32>} : memref<1x8x512xf32, #tpu.memory_space<vmem>>, vector<1x8x512xf32>,
    return
  }
  func.func @transform_0(%arg0: i32) -> (i32, i32, i32) {
    %c0_i32 = arith.constant 0 : i32
    %c0_i32_0 = arith.constant 0 : i32
    %c0_i32_1 = arith.constant 0 : i32
    return %arg0, %c0_i32, %c0_i32_0 : i32, i32, i32
  }
  func.func @transform_1(%arg0: i32) -> (i32, i32) {
    %c0_i32 = arith.constant 0 : i32
    %c0_i32_0 = arith.constant 0 : i32
    %c0_i32_1 = arith.constant 0 : i32
    return %c0_i32, %c0_i32_0 : i32, i32
  }
  func.func @transform_2(%arg0: i32) -> (i32, i32) {
    %c0_i32 = arith.constant 0 : i32
    %c0_i32_0 = arith.constant 0 : i32
    %c0_i32_1 = arith.constant 0 : i32
    return %c0_i32, %c0_i32_0 : i32, i32
  }
  func.func @transform_3(%arg0: i32) -> (i32, i32) {
    %c0_i32 = arith.constant 0 : i32
    %c0_i32_0 = arith.constant 0 : i32
    %c0_i32_1 = arith.constant 0 : i32
    return %c0_i32, %c0_i32_0 : i32, i32
  }
  func.func @transform_4(%arg0: i32) -> (i32, i32) {
    %c0_i32 = arith.constant 0 : i32
    %c0_i32_0 = arith.constant 0 : i32
    %c0_i32_1 = arith.constant 0 : i32
    return %c0_i32, %c0_i32_0 : i32, i32
  }
  func.func @transform_5(%arg0: i32) -> (i32, i32) {
    %c0_i32 = arith.constant 0 : i32
    %c0_i32_0 = arith.constant 0 : i32
    %c0_i32_1 = arith.constant 0 : i32
    return %c0_i32, %c0_i32_0 : i32, i32
  }
  func.func @transform_6(%arg0: i32) -> (i32, i32) {
    %c0_i32 = arith.constant 0 : i32
    %c0_i32_0 = arith.constant 0 : i32
    %c0_i32_1 = arith.constant 0 : i32
    return %c0_i32, %c0_i32_0 : i32, i32
  }
  func.func @transform_7(%arg0: i32) -> (i32, i32) {
    %c0_i32 = arith.constant 0 : i32
    %c0_i32_0 = arith.constant 0 : i32
    %c0_i32_1 = arith.constant 0 : i32
    return %c0_i32, %c0_i32_0 : i32, i32
  }
  func.func @transform_8(%arg0: i32) -> (i32, i32) {
    %c0_i32 = arith.constant 0 : i32
    %c0_i32_0 = arith.constant 0 : i32
    %c0_i32_1 = arith.constant 0 : i32
    return %c0_i32, %c0_i32_0 : i32, i32
  }
  func.func @transform_9(%arg0: i32) -> (i32, i32) {
    %c0_i32 = arith.constant 0 : i32
    %c0_i32_0 = arith.constant 0 : i32
    %c0_i32_1 = arith.constant 0 : i32
    return %c0_i32, %c0_i32_0 : i32, i32
  }
  func.func @transform_10(%arg0: i32) -> (i32, i32) {
    %c0_i32 = arith.constant 0 : i32
    %c0_i32_0 = arith.constant 0 : i32
    %c0_i32_1 = arith.constant 0 : i32
    return %c0_i32, %c0_i32_0 : i32, i32
  }
  func.func @transform_11(%arg0: i32) -> (i32, i32) {
    %c0_i32 = arith.constant 0 : i32
    %c0_i32_0 = arith.constant 0 : i32
    %c0_i32_1 = arith.constant 0 : i32
    return %c0_i32, %c0_i32_0 : i32, i32
  }
  func.func @transform_12(%arg0: i32) -> (i32, i32) {
    %c0_i32 = arith.constant 0 : i32
    %c0_i32_0 = arith.constant 0 : i32
    %c0_i32_1 = arith.constant 0 : i32
    return %c0_i32, %c0_i32_0 : i32, i32
  }
  func.func @transform_13(%arg0: i32) -> (i32, i32) {
    %c0_i32 = arith.constant 0 : i32
    %c0_i32_0 = arith.constant 0 : i32
    %c0_i32_1 = arith.constant 0 : i32
    return %c0_i32, %c0_i32_0 : i32, i32
  }
  func.func @transform_14(%arg0: i32) -> (i32, i32) {
    %c0_i32 = arith.constant 0 : i32
    %c0_i32_0 = arith.constant 0 : i32
    %c0_i32_1 = arith.constant 0 : i32
    return %c0_i32, %c0_i32_0 : i32, i32
  }
  func.func @transform_15(%arg0: i32) -> (i32, i32, i32) {
    %c0_i32 = arith.constant 0 : i32
    %c0_i32_0 = arith.constant 0 : i32
    %c0_i32_1 = arith.constant 0 : i32
    return %arg0, %c0_i32, %c0_i32_0 : i32, i32, i32
  }
}

</mosaic_0001>

<bundles_post_ra>
// kernel: _lambda_.1
= control target key start
LH: loop header
LB: loop body
LE: loop exit
PB: predicated region body
PF: predicated region fallthrough
CT: control target
= control target key end

     0   :  { %20 = vsyncpa [#allocation4], 0  ;;  %s3281_s0 = inlined_call_operand.vmem [shape: f32[1,8,512], index: 0, kind: input, shape index: {}]   ;;  %s3282_s1 = inlined_call_operand.vmem [shape: f32[72,512], index: 1, kind: input, shape index: {}]   ;;  %s3283_s2 = inlined_call_operand.hbm [shape: bf16[256,256], index: 2, kind: input, shape index: {}]   ;;  %s3284_s3 = inlined_call_operand.hbm [shape: bf16[8,72], index: 3, kind: input, shape index: {}]   ;;  %s3285_s4 = inlined_call_operand.hbm [shape: f32[8,1], index: 4, kind: input, shape index: {}]   ;;  %s3286_s5 = inlined_call_operand.hbm [shape: f32[8,8], index: 5, kind: input, shape index: {}]   ;;  %s3287_s6 = inlined_call_operand.hbm [shape: f32[8,1], index: 6, kind: input, shape index: {}]   ;;  %s3288_s7 = inlined_call_operand.hbm [shape: f32[8,8], index: 7, kind: input, shape index: {}]   ;;  %s3289_s8 = inlined_call_operand.hbm [shape: f32[8,1], index: 8, kind: input, shape index: {}]   ;;  %s3290_s9 = inlined_call_operand.hbm [shape: f32[8,8], index: 9, kind: input, shape index: {}]   ;;  %s3291_s10 = inlined_call_operand.hbm [shape: f32[8,1], index: 10, kind: input, shape index: {}]   ;;  %s3292_s11 = inlined_call_operand.vmem [shape: f32[8,8], index: 11, kind: input, shape index: {}]   ;;  %s3293_s12 = inlined_call_operand.hbm [shape: f32[8,1], index: 12, kind: input, shape index: {}]   ;;  %s3294_s13 = inlined_call_operand.hbm [shape: bf16[8,72], index: 13, kind: input, shape index: {}]   ;;  %s3295_s14 = inlined_call_operand.hbm [shape: f32[8,1], index: 14, kind: input, shape index: {}]   ;;  %s3296_s15 = inlined_call_operand.vmem [shape: f32[1,8,512], index: 15, kind: output, shape index: {}]  }
   0x1   :  { %21 = vsyncpa [#allocation6], 0 }
   0x2   :  { %22 = vsyncpa [#allocation9], 0 }
   0x3   :  { %23 = vsyncpa [#allocation12], 0 }
   0x4   :  { %24 = vsyncpa [#allocation15], 0 }
   0x5   :  { %25 = vsyncpa [#allocation18], 0  ;;  %s49_s20 = sshll.u32 %s3284_s3, 4  ;;  %s50_s20 = int_to_ptr.hbm [resolvable:$true] %s49_s20 }
   0x6   :  { %26 = vsyncpa [#allocation21], 0  ;;  %s2426_s21 = smov [#allocation5]   ;;  %s71_s25 = sshll.u32 %s3286_s5, 4  ;;  %s72_s25 = int_to_ptr.hbm [resolvable:$true] %s71_s25 }
   0x7   :  { %s51_s22 = sshll.u32 %s2426_s21, 4  ;;  %s2427_s26 = smov [#allocation8]   ;;  %s52_s22 = int_to_ptr.vmem [resolvable:$true] %s51_s22 }
   0x8   :  { %54 = dma.hbm_to_vmem [thread:$0]  %s50_s20, 64, %s52_s22, [#allocation6]  }
   0x9   :  { %s73_s27 = sshll.u32 %s2427_s26, 4  ;;  %s93_s30 = sshll.u32 %s3288_s7, 4  ;;  %s74_s27 = int_to_ptr.vmem [resolvable:$true] %s73_s27  ;;  %s94_s30 = int_to_ptr.hbm [resolvable:$true] %s93_s30 }
   0xa   :  { %76 = dma.hbm_to_vmem [thread:$0]  %s72_s25, 128, %s74_s27, [#allocation9]  }
   0xb   :  { %s115_s17 = sshll.u32 %s3290_s9, 4  ;;  %s2428_s18 = smov [#allocation11]   ;;  %s116_s17 = int_to_ptr.hbm [resolvable:$true] %s115_s17 }
   0xc   :  { %s95_s19 = sshll.u32 %s2428_s18, 4  ;;  %s2429_s5 = smov [#allocation14]   ;;  %s96_s19 = int_to_ptr.vmem [resolvable:$true] %s95_s19 }
   0xd   :  { %98 = dma.hbm_to_vmem [thread:$0]  %s94_s30, 128, %s96_s19, [#allocation12]  }
   0xe   :  { %s117_s20 = sshll.u32 %s2429_s5, 4  ;;  %s139_s23 = sshll.u32 %s3293_s12, 4  ;;  %s118_s20 = int_to_ptr.vmem [resolvable:$true] %s117_s20  ;;  %s140_s23 = int_to_ptr.hbm [resolvable:$true] %s139_s23 }
   0xf   :  { %120 = dma.hbm_to_vmem [thread:$0]  %s116_s17, 128, %s118_s20, [#allocation15]  }
  0x10   :  { %s35_s25 = sshll.u32 %s3283_s2, 4  ;;  %s2430_s26 = smov [#allocation17]   ;;  %s36_s25 = int_to_ptr.hbm [resolvable:$true] %s35_s25 }
  0x11   :  { %s141_s9 = sshll.u32 %s2430_s26, 4  ;;  %s2431_s27 = smov [#allocation3]   ;;  %s142_s9 = int_to_ptr.vmem [resolvable:$true] %s141_s9 }
  0x12   :  { %144 = dma.hbm_to_vmem [thread:$0]  %s140_s23, 128, %s142_s9, [#allocation18]  }
  0x13   :  { %s37_s28 = sshll.u32 %s2431_s27, 4  ;;  %s2432_s29 = smov 128   ;;  %s38_s28 = int_to_ptr.vmem [resolvable:$true] %s37_s28 }
  0x14   :  { %s2433_s30 = smov 8   ;;  %s60_s16 = sshll.u32 %s3285_s4, 4  ;;  %s61_s16 = int_to_ptr.hbm [resolvable:$true] %s60_s16 }
  0x15   :  { %43 = dma.hbm_to_vmem [thread:$0]  %s36_s25, 4096, %s38_s28, [#allocation4], %s2432_s29, %s2432_s29, %s2433_s30  }
  0x16   :  { %s2434_s17 = smov [#allocation7]   ;;  %s82_s5 = sshll.u32 %s3287_s6, 4  ;;  %s83_s5 = int_to_ptr.hbm [resolvable:$true] %s82_s5 }
  0x17   :  { %s62_s18 = sshll.u32 %s2434_s17, 4  ;;  %s2435_s20 = smov [#allocation10]   ;;  %s63_s18 = int_to_ptr.vmem [resolvable:$true] %s62_s18 }
  0x18   :  { %65 = dma.hbm_to_vmem [thread:$0]  %s61_s16, 128, %s63_s18, [#allocation6]  }
  0x19   :  { %s84_s21 = sshll.u32 %s2435_s20, 4  ;;  %s104_s7 = sshll.u32 %s3289_s8, 4  ;;  %s85_s21 = int_to_ptr.vmem [resolvable:$true] %s84_s21  ;;  %s105_s7 = int_to_ptr.hbm [resolvable:$true] %s104_s7 }
  0x1a   :  { %87 = dma.hbm_to_vmem [thread:$0]  %s83_s5, 128, %s85_s21, [#allocation9]  }
  0x1b   :  { %s126_s25 = sshll.u32 %s3291_s10, 4  ;;  %s2436_s26 = smov [#allocation13]   ;;  %s127_s25 = int_to_ptr.hbm [resolvable:$true] %s126_s25 }
  0x1c   :  { %s106_s9 = sshll.u32 %s2436_s26, 4  ;;  %s2437_s6 = smov [#allocation16]   ;;  %s107_s9 = int_to_ptr.vmem [resolvable:$true] %s106_s9 }
  0x1d   :  { %109 = dma.hbm_to_vmem [thread:$0]  %s105_s7, 128, %s107_s9, [#allocation12]  }
  0x1e   :  { %s128_s27 = sshll.u32 %s2437_s6, 4  ;;  %s150_s30 = sshll.u32 %s3294_s13, 4  ;;  %s129_s27 = int_to_ptr.vmem [resolvable:$true] %s128_s27  ;;  %s151_s30 = int_to_ptr.hbm [resolvable:$true] %s150_s30 }
  0x1f   :  { %131 = dma.hbm_to_vmem [thread:$0]  %s127_s25, 128, %s129_s27, [#allocation15]  }
  0x20   :  { %s161_s12 = sshll.u32 %s3295_s14, 4  ;;  %s2438_s16 = smov [#allocation19]   ;;  %s162_s12 = int_to_ptr.hbm [resolvable:$true] %s161_s12 }
  0x21   :  { %s152_s10 = sshll.u32 %s2438_s16, 4  ;;  %s2439_s17 = smov [#allocation20]   ;;  %s153_s10 = int_to_ptr.vmem [resolvable:$true] %s152_s10 }
  0x22   :  { %155 = dma.hbm_to_vmem [thread:$0]  %s151_s30, 64, %s153_s10, [#allocation18]  }
  0x23   :  { %s163_s18 = sshll.u32 %s2439_s17, 4  ;;  %s164_s18 = int_to_ptr.vmem [resolvable:$true] %s163_s18 }
  0x24   :  { %166 = dma.hbm_to_vmem [thread:$0]  %s162_s12, 128, %s164_s18, [#allocation21]  }
  0x25   :  { %2412 = dma.done.wait [#allocation4], 4096  }
  0x26   :  { %2413 = vsyncadd [#allocation4], 4294963200 }
  0x27   :  { %2414 = dma.done.wait [#allocation6], 192  }
  0x28   :  { %2415 = vsyncadd [#allocation6], 4294967104 }
  0x29   :  { %2416 = dma.done.wait [#allocation9], 256  }
  0x2a   :  { %2417 = vsyncadd [#allocation9], 4294967040 }
  0x2b   :  { %2418 = dma.done.wait [#allocation12], 256  }
  0x2c   :  { %2419 = vsyncadd [#allocation12], 4294967040 }
  0x2d   :  { %2420 = dma.done.wait [#allocation15], 256  }
  0x2e   :  { %2421 = vsyncadd [#allocation15], 4294967040 }
  0x2f   :  { %2422 = dma.done.wait [#allocation18], 192  }
  0x30   :  { %2423 = vsyncadd [#allocation18], 4294967104 }
  0x31   :  { %2424 = dma.done.wait [#allocation21], 128  }
  0x32   :  { %2425 = vsyncadd [#allocation21], 4294967168  ;;  %v219_v0 = vld [vmem:[%s3281_s0 + $0x18] sm:$0xff]  ;;  %v2572_v1 = vld [vmem:[%s3281_s0] sm:$0xff]  ;;  %s2440_s5 = smov 111   ;;  %s2441_s20 = smov 113   ;;  %v228_v7 = vlaneseq }
  0x33   :  { %407 = vrot.lane.b32.xlu1 %v219_v0, %s2440_s5  ;;  %351 = vrot.lane.b32.xlu2 %v2572_v1, %s2441_s20  ;;  %v2582_v2 = vld [vmem:[%s3281_s0 + $0x8] sm:$0xff]  ;;  %v218_v3 = vld [vmem:[%s3281_s0 + $0x10] sm:$0xff]  ;;  %s2442_s4 = smov 112   ;;  %s2443_s24 = smov 127   ;;  %vm545_vm3 = vcmask 1043456   ;;  %vm541_vm9 = vcmask 588800  }
  0x34   :  { %401 = vrot.lane.b32.xlu0 %v2572_v1, %s2440_s5  ;;  %s2444_s25 = smov 15   ;;  %s2445_s26 = smov 1   ;;  %v2638_v10 = vand.u32 127, %v228_v7  ;;  %v2641_v12 = vpack.c.bf16 %v219_v0, %v218_v3  ;;  %v414_v13 = vld [vmem:[%s3282_s1 + $0x100] sm:$0xff]  ;;  %v417_v14 = vld [vmem:[%s3282_s1 + $0x118] sm:$0xff]  ;;  %v415_v18 = vld [vmem:[%s3282_s1 + $0x108] sm:$0xff] }
  0x35   :  { %s2446_s9 = smov 17   ;;  %s2447_s6 = smov 16   ;;  %v416_v19 = vld [vmem:[%s3282_s1 + $0x110] sm:$0xff]  ;;  %v390_v28 = vld [vmem:[%s3282_s1 + $0xe8] sm:$0xff]  ;;  %v389_v32 = vld [vmem:[%s3282_s1 + $0xe0] sm:$0xff]  ;;  %vm927_vm10 = vcmask 64512  }
  0x36   :  { %vm409_vm0 = vcmp.lt.s32.totalorder %v2638_v10, 111  ;;  %325 = vst [vmem:[#allocation2 + $0x48] sm:$0xff] %v2641_v12  ;;  %vm384_vm1 = vcmp.lt.s32.totalorder %v2638_v10, 112  ;;  %vm359_vm2 = vcmp.lt.s32.totalorder %v2638_v10, 113  ;;  %v366_v40 = vld [vmem:[%s3282_s1 + $0xd0] sm:$0xff]  ;;  %v367_v41 = vld [vmem:[%s3282_s1 + $0xd8] sm:$0xff] }
  0x37   :  { %v391_v61 = vld [vmem:[%s3282_s1 + $0xf0] sm:$0xff]  ;;  %v392_v62 = vld [vmem:[%s3282_s1 + $0xf8] sm:$0xff]  ;;  %vm334_vm4 = vcmp.lt.s32.totalorder %v2638_v10, 127  ;;  %vm280_vm5 = vcmp.lt.s32.totalorder %v2638_v10, 15  ;;  %vm305_vm6 = vcmp.lt.s32.totalorder %v2638_v10, 1  ;;  %vm230_vm7 = vcmp.lt.s32.totalorder %v2638_v10, 17 }
  0x38   :  { %vm255_vm8 = vcmp.lt.s32.totalorder %v2638_v10, 16 }
  0x3b   :  { %403 = vrot.lane.b32.xlu1 %v2582_v2, %s2440_s5  ;;  %355 = vrot.lane.b32.xlu2 %v218_v3, %s2441_s20 }
  0x3c   :  { %405 = vrot.lane.b32.xlu0 %v218_v3, %s2440_s5 }
  0x43   :  { %376 = vrot.lane.b32.xlu1 %v2572_v1, %s2442_s4  ;;  %380 = vrot.lane.b32.xlu2 %v218_v3, %s2442_s4 }
  0x44   :  { %357 = vrot.lane.b32.xlu0 %v219_v0, %s2441_s20 }
  0x4b   :  { %326 = vrot.lane.b32.xlu1 %v2572_v1, %s2443_s24  ;;  %330 = vrot.lane.b32.xlu2 %v218_v3, %s2443_s24 }
  0x4c   :  { %382 = vrot.lane.b32.xlu0 %v219_v0, %s2442_s4 }
  0x53   :  { %353 = vrot.lane.b32.xlu1 %v2582_v2, %s2441_s20  ;;  %378 = vrot.lane.b32.xlu2 %v2582_v2, %s2442_s4 }
  0x54   :  { %332 = vrot.lane.b32.xlu0 %v219_v0, %s2443_s24 }
  0x5b   :  { %276 = vrot.lane.b32.xlu1 %v218_v3, %s2444_s25  ;;  %278 = vrot.lane.b32.xlu2 %v219_v0, %s2444_s25 }
  0x5c   :  { %274 = vrot.lane.b32.xlu0 %v2582_v2, %s2444_s25 }
  0x63   :  { %301 = vrot.lane.b32.xlu1 %v218_v3, %s2445_s26  ;;  %303 = vrot.lane.b32.xlu2 %v219_v0, %s2445_s26 }
  0x64   :  { %299 = vrot.lane.b32.xlu0 %v2582_v2, %s2445_s26 }
  0x6b   :  { %222 = vrot.lane.b32.xlu1 %v2582_v2, %s2446_s9  ;;  %224 = vrot.lane.b32.xlu2 %v218_v3, %s2446_s9 }
  0x6c   :  { %328 = vrot.lane.b32.xlu0 %v2582_v2, %s2443_s24 }
  0x73   :  { %249 = vrot.lane.b32.xlu1 %v2582_v2, %s2447_s6  ;;  %251 = vrot.lane.b32.xlu2 %v218_v3, %s2447_s6 }
  0x74   :  { %226 = vrot.lane.b32.xlu0 %v219_v0, %s2446_s9 }
  0x7b   :  { %272 = vrot.lane.b32.xlu1 %v2572_v1, %s2444_s25  ;;  %297 = vrot.lane.b32.xlu2 %v2572_v1, %s2445_s26 }
  0x7c   :  { %253 = vrot.lane.b32.xlu0 %v219_v0, %s2447_s6 }
  0x83   :  { %247 = vrot.lane.b32.xlu1 %v2572_v1, %s2447_s6 }
  0x84   :  { %220 = vrot.lane.b32.xlu0 %v2572_v1, %s2446_s9 }
  0x8d   :  { %v2630_v4 = vpop.permute.xlu2 %351 }
  0x95   :  { %v2632_v5 = vpop.permute.xlu2 %355 }
  0x9d   :  { %v2634_v6 = vpop.permute.xlu2 %380 }
  0xa5   :  { %v408_v8 = vpop.permute.xlu1 %407  ;;  %v2636_v9 = vpop.permute.xlu2 %330 }
  0xa6   :  { %v402_v11 = vpop.permute.xlu0 %401 }
  0xa7   :  { %v413_v15 = vsel %vm409_vm0, %v408_v8, %v402_v11 }
  0xa8   :  { %v421_v25 = vmul.f32 %v417_v14, %v413_v15  ;;  %v364_v14 = vld [vmem:[%s3282_s1 + $0xc0] sm:$0xff]  ;;  %v365_v15 = vld [vmem:[%s3282_s1 + $0xc8] sm:$0xff] }
  0xad   :  { %v404_v16 = vpop.permute.xlu1 %403  ;;  %v379_v17 = vpop.permute.xlu2 %378 }
  0xae   :  { %v412_v20 = vsel %vm409_vm0, %v402_v11, %v404_v16  ;;  %v406_v21 = vpop.permute.xlu0 %405  ;;  %v386_v29 = vsel %vm384_vm1, %v379_v17, %v2634_v6 }
  0xaf   :  { %v418_v22 = vmul.f32 %v414_v13, %v412_v20  ;;  %v410_v23 = vsel %vm409_vm0, %v406_v21, %v408_v8  ;;  %v411_v24 = vsel %vm409_vm0, %v404_v16, %v406_v21  ;;  %v394_v37 = vmul.f32 %v390_v28, %v386_v29 }
  0xb0   :  { %v419_v26 = vmul.f32 %v415_v18, %v411_v24  ;;  %v420_v27 = vmul.f32 %v416_v19, %v410_v23  ;;  %v2712_v13 = vpack.c.bf16 %v2582_v2, %v2572_v1  ;;  %v342_v1 = vld [vmem:[%s3282_s1 + $0xb8] sm:$0xff] }
  0xb2   :  { %v422_v30 = vpack.c.bf16 %v419_v26, %v418_v22  ;;  %v423_v31 = vpack.c.bf16 %v421_v25, %v420_v27  ;;  %324 = vst [vmem:[#allocation2 + $0x40] sm:$0xff] %v2712_v13 }
  0xb4   :  { %v501_v33 = vunpack.c.l.b16 %v422_v30  ;;  %v502_v34 = vunpack.c.h.b16 %v422_v30  ;;  %v503_v35 = vunpack.c.l.b16 %v423_v31  ;;  %v504_v36 = vunpack.c.h.b16 %v423_v31  ;;  %v288_v30 = vld [vmem:[%s3282_s1 + $0x58] sm:$0xff] }
  0xb5   :  { %v377_v38 = vpop.permute.xlu1 %376  ;;  %v2675_v39 = vpop.permute.xlu2 %278 }
  0xb6   :  { %v387_v42 = vsel %vm384_vm1, %v377_v38, %v379_v17  ;;  %v358_v43 = vpop.permute.xlu0 %357  ;;  %v521_v44 = vpack.c.b16 %v501_v33, %v501_v33  ;;  %v522_v45 = vpack.c.b16 %v502_v34, %v502_v34  ;;  %v523_v46 = vpack.c.b16 %v503_v35, %v503_v35  ;;  %v341_v17 = vld [vmem:[%s3282_s1 + $0xb0] sm:$0xff] }
  0xb7   :  { %v393_v47 = vmul.f32 %v389_v32, %v387_v42  ;;  %v360_v48 = vsel %vm359_vm2, %v2632_v5, %v358_v43  ;;  %v363_v49 = vsel %vm359_vm2, %v358_v43, %v2630_v4  ;;  %v524_v50 = vpack.c.b16 %v504_v36, %v504_v36  ;;  %v287_v35 = vld [vmem:[%s3282_s1 + $0x50] sm:$0xff]  ;;  %v1758_v43 = vld [vmem:[#allocation2 + $0x48] sm:$0xf] }
  0xb8   :  { %v370_v51 = vmul.f32 %v366_v40, %v360_v48  ;;  %v371_v52 = vmul.f32 %v367_v41, %v363_v49  ;;  %v547_v53 = vsel %vm545_vm3, %v521_v44, 0  ;;  %v550_v54 = vsel %vm545_vm3, %v522_v45, 0  ;;  %v2003_v44 = vld [vmem:[#allocation2 + $0x4c] sm:$0xf] }
  0xb9   :  { %v397_v55 = vpack.c.bf16 %v394_v37, %v393_v47  ;;  %561 = vmatpush.bf16.msra.mxu0 %v547_v53  ;;  %574 = vmatpush.bf16.msra.mxu1 %v550_v54  ;;  %v553_v56 = vsel %vm545_vm3, %v523_v46, 0  ;;  %v556_v57 = vsel %vm545_vm3, %v524_v50, 0  ;;  %v313_v53 = vld [vmem:[%s3282_s1 + $0x78] sm:$0xff]  ;;  %v310_v54 = vld [vmem:[%s3282_s1 + $0x60] sm:$0xff] }
  0xba   :  { %v373_v58 = vpack.c.bf16 %v371_v52, %v370_v51  ;;  %587 = vmatpush.bf16.msra.mxu2 %v553_v56  ;;  %600 = vmatpush.bf16.msra.mxu3 %v556_v57 }
  0xbb   :  { %399 = vst [vmem:[#allocation2 + $0x70] sm:$0xff] %v397_v55 }
  0xbc   :  { %375 = vst [vmem:[#allocation2 + $0x68] sm:$0xff] %v373_v58 }
  0xbd   :  { %v2695_v59 = vpop.permute.xlu1 %326  ;;  %v2697_v60 = vpop.permute.xlu2 %303 }
  0xbe   :  { %v383_v63 = vpop.permute.xlu0 %382 }
  0xbf   :  { %v385_v0 = vsel %vm384_vm1, %v2634_v6, %v383_v63  ;;  %v388_v3 = vsel %vm384_vm1, %v383_v63, %v377_v38 }
  0xc0   :  { %v395_v7 = vmul.f32 %v391_v61, %v385_v0  ;;  %v396_v8 = vmul.f32 %v392_v62, %v388_v3  ;;  %v311_v61 = vld [vmem:[%s3282_s1 + $0x68] sm:$0xff]  ;;  %v312_v62 = vld [vmem:[%s3282_s1 + $0x70] sm:$0xff] }
  0xc2   :  { %v398_v11 = vpack.c.bf16 %v396_v8, %v395_v7  ;;  %v2008_v42 = vld [vmem:[#allocation2 + $0x6c] sm:$0xf0]  ;;  %v1768_v48 = vld [vmem:[#allocation2 + $0x70] sm:$0xf0] }
  0xc3   :  { %v2007_v28 = vld [vmem:[#allocation2 + $0x6c] sm:$0xf] }
  0xc4   :  { %400 = vst [vmem:[#allocation2 + $0x78] sm:$0xff] %v398_v11 }
  0xc5   :  { %v354_v6 = vpop.permute.xlu1 %353  ;;  %v2721_v16 = vpop.permute.xlu2 %224 }
  0xc6   :  { %v361_v2 = vsel %vm359_vm2, %v354_v6, %v2632_v5  ;;  %v362_v18 = vsel %vm359_vm2, %v2630_v4, %v354_v6  ;;  %v333_v19 = vpop.permute.xlu0 %332  ;;  %v1774_v5 = vld [vmem:[#allocation2 + $0x68] sm:$0xf] }
  0xc7   :  { %v368_v20 = vmul.f32 %v364_v14, %v362_v18  ;;  %v369_v21 = vmul.f32 %v365_v15, %v361_v2  ;;  %v335_v22 = vsel %vm334_vm4, %v2636_v9, %v333_v19  ;;  %v338_v23 = vsel %vm334_vm4, %v333_v19, %v2695_v59  ;;  %v340_v18 = vld [vmem:[%s3282_s1 + $0xa8] sm:$0xff] }
  0xc8   :  { %v345_v24 = vmul.f32 %v341_v17, %v335_v22  ;;  %v346_v25 = vmul.f32 %v342_v1, %v338_v23 }
  0xc9   :  { %v372_v26 = vpack.c.bf16 %v369_v21, %v368_v20 }
  0xca   :  { %v348_v27 = vpack.c.bf16 %v346_v25, %v345_v24 }
  0xcb   :  { %374 = vst [vmem:[#allocation2 + $0x60] sm:$0xff] %v372_v26  ;;  %v2009_v4 = vld [vmem:[#allocation2 + $0x74] sm:$0xf0]  ;;  %v1776_v29 = vld [vmem:[#allocation2 + $0x78] sm:$0xf0] }
  0xcc   :  { %350 = vst [vmem:[#allocation2 + $0x58] sm:$0xff] %v348_v27  ;;  %v1775_v31 = vor.u32 %v2009_v4, %v1774_v5  ;;  %v1779_v32 = vor.u32 %v2007_v28, %v1776_v29  ;;  %v237_v28 = vld [vmem:[%s3282_s1 + $0x10] sm:$0xff] }
  0xcd   :  { %v277_v33 = vpop.permute.xlu1 %276  ;;  %v2746_v34 = vpop.permute.xlu2 %251 }
  0xce   :  { %v281_v36 = vsel %vm280_vm5, %v277_v33, %v2675_v39  ;;  %588 = vmatpush.bf16.msra.mxu2 %v1775_v31  ;;  %601 = vmatpush.bf16.msra.mxu3 %v1779_v32  ;;  %v2754_v37 = vpop.permute.xlu0 %274 }
  0xcf   :  { %v292_v38 = vmul.f32 %v288_v30, %v281_v36  ;;  %v282_v40 = vsel %vm280_vm5, %v2754_v37, %v277_v33  ;;  %v238_v30 = vld [vmem:[%s3282_s1 + $0x18] sm:$0xff]  ;;  %v1750_v36 = vld [vmem:[#allocation2 + $0x40] sm:$0xf] }
  0xd0   :  { %v291_v41 = vmul.f32 %v287_v35, %v282_v40 }
  0xd2   :  { %v294_v45 = vpack.c.bf16 %v292_v38, %v291_v41  ;;  %v1766_v46 = vld [vmem:[#allocation2 + $0x60] sm:$0xf]  ;;  %v2006_v47 = vld [vmem:[#allocation2 + $0x64] sm:$0xf] }
  0xd3   :  { %v1767_v49 = vor.u32 %v2008_v42, %v1766_v46  ;;  %v1771_v50 = vor.u32 %v2006_v47, %v1768_v48  ;;  %v2005_v51 = vld [vmem:[#allocation2 + $0x54] sm:$0xf0]  ;;  %v1760_v52 = vld [vmem:[#allocation2 + $0x58] sm:$0xf0]  ;;  %v2002_v38 = vld [vmem:[#allocation2 + $0x44] sm:$0xf] }
  0xd4   :  { %296 = vst [vmem:[#allocation2 + $0x28] sm:$0xff] %v294_v45  ;;  %v1759_v55 = vor.u32 %v2005_v51, %v1758_v43  ;;  %v1763_v56 = vor.u32 %v2003_v44, %v1760_v52  ;;  %v285_v43 = vld [vmem:[%s3282_s1 + $0x40] sm:$0xff]  ;;  %v286_v44 = vld [vmem:[%s3282_s1 + $0x48] sm:$0xff]  ;;  %v262_v46 = vld [vmem:[%s3282_s1 + $0x30] sm:$0xff] }
  0xd5   :  { %v302_v57 = vpop.permute.xlu1 %301  ;;  %v298_v58 = vpop.permute.xlu2 %297  ;;  %562 = vmatpush.bf16.msra.mxu0 %v1767_v49  ;;  %575 = vmatpush.bf16.msra.mxu1 %v1771_v50  ;;  %v263_v49 = vld [vmem:[%s3282_s1 + $0x38] sm:$0xff] }
  0xd6   :  { %v306_v63 = vsel %vm305_vm6, %v302_v57, %v2697_v60  ;;  %v309_v0 = vsel %vm305_vm6, %v2697_v60, %v298_v58  ;;  %589 = vmatpush.bf16.msra.mxu2 %v1759_v55  ;;  %602 = vmatpush.bf16.msra.mxu3 %v1763_v56  ;;  %v300_v3 = vpop.permute.xlu0 %299  ;;  %v339_v60 = vld [vmem:[%s3282_s1 + $0xa0] sm:$0xff] }
  0xd7   :  { %v317_v7 = vmul.f32 %v313_v53, %v306_v63  ;;  %v314_v8 = vmul.f32 %v310_v54, %v309_v0  ;;  %v307_v11 = vsel %vm305_vm6, %v300_v3, %v302_v57  ;;  %v308_v14 = vsel %vm305_vm6, %v298_v58, %v300_v3  ;;  %v235_v63 = vld [vmem:[%s3282_s1] sm:$0xff] }
  0xd8   :  { %v315_v15 = vmul.f32 %v311_v61, %v308_v14  ;;  %v316_v6 = vmul.f32 %v312_v62, %v307_v11 }
  0xda   :  { %v318_v17 = vpack.c.bf16 %v315_v15, %v314_v8  ;;  %v319_v1 = vpack.c.bf16 %v317_v7, %v316_v6  ;;  %v2024_v6 = vld [vmem:[#allocation3 + $0x74] sm:$0xf] }
  0xdb   :  { %v1742_v25 = vld [vmem:[#allocation2 + $0x28] sm:$0xf]  ;;  %v1999_v26 = vld [vmem:[#allocation2 + $0x2c] sm:$0xf] }
  0xdc   :  { %320 = vst [vmem:[#allocation2 + $0x30] sm:$0xff] %v318_v17 }
  0xdd   :  { %321 = vst [vmem:[#allocation2 + $0x38] sm:$0xff] %v319_v1  ;;  %v2782_v2 = vpop.permute.xlu1 %222 }
  0xde   :  { %v329_v19 = vpop.permute.xlu0 %328 }
  0xdf   :  { %v336_v20 = vsel %vm334_vm4, %v329_v19, %v2636_v9  ;;  %v337_v21 = vsel %vm334_vm4, %v2695_v59, %v329_v19  ;;  %v232_v9 = vsel %vm230_vm7, %v2782_v2, %v2721_v16  ;;  %v1908_v19 = vld [vmem:[#allocation3 + $0xf8] sm:$0xf0] }
  0xe0   :  { %v343_v22 = vmul.f32 %v339_v60, %v337_v21  ;;  %v344_v23 = vmul.f32 %v340_v18, %v336_v20  ;;  %v241_v33 = vmul.f32 %v237_v28, %v232_v9  ;;  %v1844_v60 = vld [vmem:[#allocation3 + $0x78] sm:$0xf0]  ;;  %v2040_v18 = vld [vmem:[#allocation3 + $0xf4] sm:$0xf]  ;;  %v1836_v28 = vld [vmem:[#allocation3 + $0x68] sm:$0xf0] }
  0xe2   :  { %v347_v24 = vpack.c.bf16 %v344_v23, %v343_v22 }
  0xe3   :  { %v2000_v21 = vld [vmem:[#allocation2 + $0x2c] sm:$0xf0]  ;;  %v1736_v22 = vld [vmem:[#allocation2 + $0x30] sm:$0xf0] }
  0xe4   :  { %349 = vst [vmem:[#allocation2 + $0x50] sm:$0xff] %v347_v24  ;;  %v2001_v27 = vld [vmem:[#allocation2 + $0x34] sm:$0xf0]  ;;  %v1744_v5 = vld [vmem:[#allocation2 + $0x38] sm:$0xf0] }
  0xe5   :  { %v250_v59 = vpop.permute.xlu1 %249  ;;  %v1743_v4 = vor.u32 %v2001_v27, %v1742_v25  ;;  %v1747_v29 = vor.u32 %v1999_v26, %v1744_v5  ;;  %v2022_v5 = vld [vmem:[#allocation3 + $0x64] sm:$0xf] }
  0xe6   :  { %v227_v31 = vpop.permute.xlu0 %226  ;;  %v257_v47 = vsel %vm255_vm8, %v250_v59, %v2746_v34 }
  0xe7   :  { %590 = vmatpush.bf16.msra.mxu2 %v1743_v4  ;;  %603 = vmatpush.bf16.msra.mxu3 %v1747_v29  ;;  %v231_v32 = vsel %vm230_vm7, %v2721_v16, %v227_v31  ;;  %v266_v56 = vmul.f32 %v262_v46, %v257_v47  ;;  %v2856_v29 = vor.u32 %v2024_v6, %v1844_v60  ;;  %v2036_v46 = vld [vmem:[#allocation3 + $0xd4] sm:$0xf]  ;;  %v1892_v47 = vld [vmem:[#allocation3 + $0xd8] sm:$0xf0]  ;;  %v1890_v6 = vld [vmem:[#allocation3 + $0xd0] sm:$0xf] }
  0xe8   :  { %v242_v35 = vmul.f32 %v238_v30, %v231_v32  ;;  %v2858_v30 = vor.u32 %v2040_v18, %v1908_v19  ;;  %v1812_v60 = vld [vmem:[#allocation3 + $0x38] sm:$0xf0]  ;;  %v2032_v18 = vld [vmem:[#allocation3 + $0xb4] sm:$0xf] }
  0xe9   :  { %v1876_v19 = vld [vmem:[#allocation3 + $0xb8] sm:$0xf0] }
  0xea   :  { %v244_v40 = vpack.c.bf16 %v242_v35, %v241_v33  ;;  %v2038_v33 = vld [vmem:[#allocation3 + $0xe4] sm:$0xf]  ;;  %v1900_v35 = vld [vmem:[#allocation3 + $0xe8] sm:$0xf0] }
  0xeb   :  { %v2004_v41 = vld [vmem:[#allocation2 + $0x4c] sm:$0xf0]  ;;  %v1752_v42 = vld [vmem:[#allocation2 + $0x50] sm:$0xf0] }
  0xec   :  { %246 = vst [vmem:[#allocation2 + $0x8] sm:$0xff] %v244_v40  ;;  %v1751_v45 = vor.u32 %v2004_v41, %v1750_v36  ;;  %v1755_v16 = vor.u32 %v2002_v38, %v1752_v42  ;;  %v426_v36 = vld [vmem:[#allocation5] sm:$0xf]  ;;  %v2862_v38 = vor.u32 %v2022_v5, %v1836_v28  ;;  %v2864_v40 = vor.u32 %v2038_v33, %v1900_v35  ;;  %v1842_v41 = vld [vmem:[#allocation3 + $0x70] sm:$0xf] }
  0xed   :  { %v273_v48 = vpop.permute.xlu1 %272  ;;  %v2025_v42 = vld [vmem:[#allocation3 + $0x74] sm:$0xf0]  ;;  %v2014_v5 = vld [vmem:[#allocation3 + $0x24] sm:$0xf]  ;;  %v1804_v28 = vld [vmem:[#allocation3 + $0x28] sm:$0xf0] }
  0xee   :  { %v283_v50 = vsel %vm280_vm5, %v273_v48, %v2754_v37  ;;  %v284_v51 = vsel %vm280_vm5, %v2675_v39, %v273_v48  ;;  %v254_v52 = vpop.permute.xlu0 %253  ;;  %563 = vmatpush.bf16.msra.mxu0 %v1751_v45  ;;  %576 = vmatpush.bf16.msra.mxu1 %v1755_v16  ;;  %v260_v37 = vld [vmem:[%s3282_s1 + $0x20] sm:$0xff]  ;;  %v261_v39 = vld [vmem:[%s3282_s1 + $0x28] sm:$0xff]  ;;  %v2912_v33 = vor.u32 %v2014_v5, %v1804_v28 }
  0xef   :  { %v289_v53 = vmul.f32 %v285_v43, %v284_v51  ;;  %v290_v54 = vmul.f32 %v286_v44, %v283_v50  ;;  %v256_v55 = vsel %vm255_vm8, %v2746_v34, %v254_v52  ;;  %v236_v34 = vld [vmem:[%s3282_s1 + $0x8] sm:$0xff]  ;;  %v1906_v43 = vld [vmem:[#allocation3 + $0xf0] sm:$0xf]  ;;  %v2020_v45 = vld [vmem:[#allocation3 + $0x54] sm:$0xf] }
  0xf0   :  { %v267_v57 = vmul.f32 %v263_v49, %v256_v55  ;;  %v2041_v44 = vld [vmem:[#allocation3 + $0xf4] sm:$0xf0]  ;;  %v1828_v16 = vld [vmem:[#allocation3 + $0x58] sm:$0xf0]  ;;  %v1834_v50 = vld [vmem:[#allocation3 + $0x60] sm:$0xf] }
  0xf1   :  { %v293_v58 = vpack.c.bf16 %v290_v54, %v289_v53  ;;  %v2870_v53 = vor.u32 %v2025_v42, %v1842_v41  ;;  %v2872_v54 = vor.u32 %v2041_v44, %v1906_v43  ;;  %v2023_v55 = vld [vmem:[#allocation3 + $0x64] sm:$0xf0]  ;;  %v2033_v41 = vld [vmem:[#allocation3 + $0xb4] sm:$0xf0]  ;;  %v2012_v42 = vld [vmem:[#allocation3 + $0x14] sm:$0xf] }
  0xf2   :  { %v269_v61 = vpack.c.bf16 %v267_v57, %v266_v56  ;;  %v1796_v43 = vld [vmem:[#allocation3 + $0x18] sm:$0xf0]  ;;  %v2028_v44 = vld [vmem:[#allocation3 + $0x94] sm:$0xf] }
  0xf3   :  { %295 = vst [vmem:[#allocation2 + $0x20] sm:$0xff] %v293_v58  ;;  %v1726_v23 = vld [vmem:[#allocation2 + $0x8] sm:$0xf]  ;;  %v1995_v27 = vld [vmem:[#allocation2 + $0xc] sm:$0xf]  ;;  %v2874_v58 = vor.u32 %v2020_v45, %v1828_v16 }
  0xf4   :  { %271 = vst [vmem:[#allocation2 + $0x18] sm:$0xff] %v269_v61  ;;  %v2876_v61 = vor.u32 %v2036_v46, %v1892_v47  ;;  %v1860_v45 = vld [vmem:[#allocation3 + $0x98] sm:$0xf0]  ;;  %v1802_v47 = vld [vmem:[#allocation3 + $0x20] sm:$0xf] }
  0xf5   :  { %v248_v62 = vpop.permute.xlu1 %247 }
  0xf6   :  { %v258_v0 = vsel %vm255_vm8, %v248_v62, %v250_v59  ;;  %v259_v3 = vsel %vm255_vm8, %v254_v52, %v248_v62  ;;  %v221_v7 = vpop.permute.xlu0 %220  ;;  %v2018_v62 = vld [vmem:[#allocation3 + $0x44] sm:$0xf] }
  0xf7   :  { %v264_v8 = vmul.f32 %v260_v37, %v259_v3  ;;  %v265_v11 = vmul.f32 %v261_v39, %v258_v0  ;;  %v233_v14 = vsel %vm230_vm7, %v221_v7, %v2782_v2  ;;  %v234_v15 = vsel %vm230_vm7, %v227_v31, %v221_v7  ;;  %v1898_v37 = vld [vmem:[#allocation3 + $0xe0] sm:$0xf]  ;;  %v2039_v39 = vld [vmem:[#allocation3 + $0xe4] sm:$0xf0]  ;;  %v1884_v0 = vld [vmem:[#allocation3 + $0xc8] sm:$0xf0] }
  0xf8   :  { %v239_v17 = vmul.f32 %v235_v63, %v234_v15  ;;  %v240_v1 = vmul.f32 %v236_v34, %v233_v14  ;;  %v1820_v63 = vld [vmem:[#allocation3 + $0x48] sm:$0xf0]  ;;  %v2034_v34 = vld [vmem:[#allocation3 + $0xc4] sm:$0xf]  ;;  %v2880_v3 = vor.u32 %v2023_v55, %v1834_v50  ;;  %v2882_v7 = vor.u32 %v2039_v39, %v1898_v37 }
  0xf9   :  { %v268_v20 = vpack.c.bf16 %v265_v11, %v264_v8  ;;  %v1826_v8 = vld [vmem:[#allocation3 + $0x50] sm:$0xf]  ;;  %v2021_v11 = vld [vmem:[#allocation3 + $0x54] sm:$0xf0]  ;;  %v2886_v14 = vor.u32 %v2018_v62, %v1820_v63  ;;  %v2888_v15 = vor.u32 %v2034_v34, %v1884_v0  ;;  %v2926_v50 = vor.u32 %v2028_v44, %v1860_v45  ;;  %v2010_v55 = vld [vmem:[#allocation3 + $0x4] sm:$0xf] }
  0xfa   :  { %v243_v24 = vpack.c.bf16 %v240_v1, %v239_v17  ;;  %v1734_v25 = vld [vmem:[#allocation2 + $0x20] sm:$0xf]  ;;  %v1998_v26 = vld [vmem:[#allocation2 + $0x24] sm:$0xf]  ;;  %v2037_v17 = vld [vmem:[#allocation3 + $0xd4] sm:$0xf0]  ;;  %v643_v63 = vunpack.c.l.b16 %v2712_v13  ;;  %v644_v34 = vunpack.c.h.b16 %v2712_v13 }
  0xfb   :  { %270 = vst [vmem:[#allocation2 + $0x10] sm:$0xff] %v268_v20  ;;  %v1735_v2 = vor.u32 %v2000_v21, %v1734_v25  ;;  %v1739_v9 = vor.u32 %v1998_v26, %v1736_v22  ;;  %v1997_v59 = vld [vmem:[#allocation2 + $0x14] sm:$0xf0]  ;;  %v1728_v4 = vld [vmem:[#allocation2 + $0x18] sm:$0xf0]  ;;  %v2894_v20 = vor.u32 %v2021_v11, %v1826_v8  ;;  %v2896_v21 = vor.u32 %v2037_v17, %v1890_v6 }
  0xfc   :  { %245 = vst [vmem:[#allocation2] sm:$0xff] %v243_v24  ;;  %v1727_v31 = vor.u32 %v1997_v59, %v1726_v23  ;;  %v1731_v32 = vor.u32 %v1995_v27, %v1728_v4  ;;  %v2016_v1 = vld [vmem:[#allocation3 + $0x34] sm:$0xf]  ;;  %v1818_v22 = vld [vmem:[#allocation3 + $0x40] sm:$0xf]  ;;  %v2902_v25 = vor.u32 %v2032_v18, %v1876_v19  ;;  %v646_v18 = vpack.c.b16 %v644_v34, %v644_v34 }
  0xfd   :  { %564 = vmatpush.bf16.msra.mxu0 %v1735_v2  ;;  %577 = vmatpush.bf16.msra.mxu1 %v1739_v9  ;;  %v2019_v23 = vld [vmem:[#allocation3 + $0x44] sm:$0xf0]  ;;  %v2900_v24 = vor.u32 %v2016_v1, %v1812_v60  ;;  %v1882_v26 = vld [vmem:[#allocation3 + $0xc0] sm:$0xf]  ;;  %v2030_v2 = vld [vmem:[#allocation3 + $0xa4] sm:$0xf]  ;;  %v645_v60 = vpack.c.b16 %v643_v63, %v643_v63 }
  0xfe   :  { %591 = vmatpush.bf16.msra.mxu2 %v1727_v31  ;;  %604 = vmatpush.bf16.msra.mxu3 %v1731_v32  ;;  %v2035_v27 = vld [vmem:[#allocation3 + $0xc4] sm:$0xf0]  ;;  %v1868_v9 = vld [vmem:[#allocation3 + $0xa8] sm:$0xf0]  ;;  %v2906_v59 = vor.u32 %v2019_v23, %v1818_v22  ;;  %v1810_v31 = vld [vmem:[#allocation3 + $0x30] sm:$0xf] }
  0xff   :  { %v2908_v4 = vor.u32 %v2035_v27, %v1882_v26  ;;  %v2017_v32 = vld [vmem:[#allocation3 + $0x34] sm:$0xf0]  ;;  %v2914_v35 = vor.u32 %v2030_v2, %v1868_v9  ;;  %v1852_v37 = vld [vmem:[#allocation3 + $0x88] sm:$0xf0]  ;;  %v1794_v11 = vld [vmem:[#allocation3 + $0x10] sm:$0xf] }
 0x100   :  { %v2918_v16 = vor.u32 %v2017_v32, %v1810_v31  ;;  %v2013_v6 = vld [vmem:[#allocation3 + $0x14] sm:$0xf0]  ;;  %v1858_v17 = vld [vmem:[#allocation3 + $0x90] sm:$0xf]  ;;  %v1786_v23 = vld [vmem:[#allocation3] sm:$0xf] }
 0x101   :  { %1782 = vmatmul.msk.bf16.vlgmr.msra.gmra.mxu2 %vm541_vm9, %v426_v36  ;;  %1783 = vmatmul.msk.bf16.vlgmr.msra.gmra.mxu3 %vm541_vm9, %v426_v36  ;;  %v2029_v1 = vld [vmem:[#allocation3 + $0x94] sm:$0xf0]  ;;  %v1795_v19 = vor.u32 %v2013_v6, %v1794_v11  ;;  %v2011_v13 = vld [vmem:[#allocation3 + $0x4] sm:$0xf0]  ;;  %v1850_v26 = vld [vmem:[#allocation3 + $0x80] sm:$0xf] }
 0x102   :  { %835 = vmatpush.bf16.msrb.mxu2 %v2856_v29  ;;  %848 = vmatpush.bf16.msrb.mxu3 %v2858_v30  ;;  %v1996_v48 = vld [vmem:[#allocation2 + $0xc] sm:$0xf0]  ;;  %v1720_v49 = vld [vmem:[#allocation2 + $0x10] sm:$0xf0]  ;;  %v1859_v22 = vor.u32 %v2029_v1, %v1858_v17  ;;  %v2027_v27 = vld [vmem:[#allocation3 + $0x84] sm:$0xf0]  ;;  %v1787_v5 = vor.u32 %v2011_v13, %v1786_v23 }
 0x103   :  { %v1718_v51 = vld [vmem:[#allocation2] sm:$0xf]  ;;  %v1994_v52 = vld [vmem:[#allocation2 + $0x4] sm:$0xf]  ;;  %v1851_v28 = vor.u32 %v2027_v27, %v1850_v26  ;;  %v2120_v6 = vld [vmem:[%s3281_s0 + $0x18] sm:$0xff] }
 0x104   :  { %v1719_v56 = vor.u32 %v1996_v48, %v1718_v51  ;;  %v1723_v57 = vor.u32 %v1994_v52, %v1720_v49  ;;  %v2015_v48 = vld [vmem:[#allocation3 + $0x24] sm:$0xf0]  ;;  %v2924_v49 = vor.u32 %v2012_v42, %v1796_v43  ;;  %v1866_v51 = vld [vmem:[#allocation3 + $0xa0] sm:$0xf]  ;;  %v921_v2 = vld [vmem:[#allocation10] sm:$0xff] }
 0x105   :  { %v2031_v52 = vld [vmem:[#allocation3 + $0xa4] sm:$0xf0]  ;;  %v1803_v39 = vor.u32 %v2015_v48, %v1802_v47 }
 0x106   :  { %836 = vmatpush.bf16.msrb.mxu2 %v2862_v38  ;;  %849 = vmatpush.bf16.msrb.mxu3 %v2864_v40  ;;  %v1867_v62 = vor.u32 %v2031_v52, %v1866_v51 }
 0x107   :  { %565 = vmatpush.bf16.msra.mxu0 %v1719_v56  ;;  %578 = vmatpush.bf16.msra.mxu1 %v1723_v57  ;;  %v1788_v56 = vld [vmem:[#allocation3 + $0x8] sm:$0xf0]  ;;  %v2026_v57 = vld [vmem:[#allocation3 + $0x84] sm:$0xf] }
 0x108   :  { %v1791_v0 = vor.u32 %v2010_v55, %v1788_v56  ;;  %v1855_v8 = vor.u32 %v2026_v57, %v1852_v37  ;;  %v2118_v56 = vld [vmem:[%s3281_s0 + $0x8] sm:$0xff] }
 0x10a   :  { %837 = vmatpush.bf16.msrb.mxu2 %v2874_v58  ;;  %850 = vmatpush.bf16.msrb.mxu3 %v2876_v61 }
 0x10b   :  { %809 = vmatpush.bf16.msrb.mxu0 %v2870_v53  ;;  %822 = vmatpush.bf16.msrb.mxu1 %v2872_v54 }
 0x10c   :  { %1780 = vmatmul.msk.bf16.vlgmr.msra.gmra.mxu0 %vm541_vm9, %v426_v36  ;;  %1781 = vmatmul.msk.bf16.vlgmr.msra.gmra.mxu1 %vm541_vm9, %v426_v36  ;;  %v1874_v36 = vld [vmem:[#allocation3 + $0xb0] sm:$0xf] }
 0x10d   :  { %v2920_v46 = vor.u32 %v2033_v41, %v1874_v36 }
 0x10e   :  { %838 = vmatpush.bf16.msrb.mxu2 %v2886_v14  ;;  %851 = vmatpush.bf16.msrb.mxu3 %v2888_v15 }
 0x10f   :  { %810 = vmatpush.bf16.msrb.mxu0 %v2880_v3  ;;  %823 = vmatpush.bf16.msrb.mxu1 %v2882_v7 }
 0x112   :  { %839 = vmatpush.bf16.msrb.mxu2 %v2900_v24  ;;  %852 = vmatpush.bf16.msrb.mxu3 %v2902_v25 }
 0x113   :  { %811 = vmatpush.bf16.msrb.mxu0 %v2894_v20  ;;  %824 = vmatpush.bf16.msrb.mxu1 %v2896_v21 }
 0x116   :  { %840 = vmatpush.bf16.msrb.mxu2 %v2912_v33  ;;  %853 = vmatpush.bf16.msrb.mxu3 %v2914_v35 }
 0x117   :  { %812 = vmatpush.bf16.msrb.mxu0 %v2906_v59  ;;  %825 = vmatpush.bf16.msrb.mxu1 %v2908_v4 }
 0x11a   :  { %841 = vmatpush.bf16.msrb.mxu2 %v2924_v49  ;;  %854 = vmatpush.bf16.msrb.mxu3 %v2926_v50 }
 0x11b   :  { %813 = vmatpush.bf16.msrb.mxu0 %v2918_v16  ;;  %826 = vmatpush.bf16.msrb.mxu1 %v2920_v46 }
 0x11e   :  { %842 = vmatpush.bf16.msrb.mxu2 %v1791_v0  ;;  %855 = vmatpush.bf16.msrb.mxu3 %v1855_v8 }
 0x11f   :  { %814 = vmatpush.bf16.msrb.mxu0 %v1803_v39  ;;  %827 = vmatpush.bf16.msrb.mxu1 %v1867_v62 }
 0x121   :  { %843 = vmatmul.bf16.vlgmr.msrb.gmra.mxu2 %v645_v60  ;;  %856 = vmatmul.bf16.vlgmr.msrb.gmra.mxu3 %v646_v18 }
 0x122   :  { %894 = vmatpush.bf16.msra.mxu2 %v2856_v29  ;;  %907 = vmatpush.bf16.msra.mxu3 %v2858_v30  ;;  %v862_v29 = vunpack.c.l.b16 %v2641_v12  ;;  %v863_v30 = vunpack.c.h.b16 %v2641_v12 }
 0x123   :  { %815 = vmatpush.bf16.msrb.mxu0 %v1795_v19  ;;  %828 = vmatpush.bf16.msrb.mxu1 %v1859_v22 }
 0x126   :  { %895 = vmatpush.bf16.msra.mxu2 %v2862_v38  ;;  %908 = vmatpush.bf16.msra.mxu3 %v2864_v40  ;;  %v864_v38 = vpack.c.b16 %v862_v29, %v862_v29  ;;  %v865_v40 = vpack.c.b16 %v863_v30, %v863_v30 }
 0x127   :  { %816 = vmatpush.bf16.msrb.mxu0 %v1787_v5  ;;  %829 = vmatpush.bf16.msrb.mxu1 %v1851_v28 }
 0x12a   :  { %896 = vmatpush.bf16.msra.mxu2 %v2874_v58  ;;  %909 = vmatpush.bf16.msra.mxu3 %v2876_v61 }
 0x12b   :  { %868 = vmatpush.bf16.msra.mxu0 %v2870_v53  ;;  %881 = vmatpush.bf16.msra.mxu1 %v2872_v54 }
 0x12c   :  { %817 = vmatmul.bf16.vlgmr.msrb.gmra.mxu0 %v645_v60  ;;  %830 = vmatmul.bf16.vlgmr.msrb.gmra.mxu1 %v646_v18  ;;  %v2121_v60 = vld [vmem:[%s3281_s0 + $0x10] sm:$0xff] }
 0x12e   :  { %897 = vmatpush.bf16.msra.mxu2 %v2886_v14  ;;  %910 = vmatpush.bf16.msra.mxu3 %v2888_v15 }
 0x12f   :  { %869 = vmatpush.bf16.msra.mxu0 %v2880_v3  ;;  %882 = vmatpush.bf16.msra.mxu1 %v2882_v7 }
 0x132   :  { %898 = vmatpush.bf16.msra.mxu2 %v2900_v24  ;;  %911 = vmatpush.bf16.msra.mxu3 %v2902_v25  ;;  %v920_v24 = vld [vmem:[#allocation8] sm:$0xff]  ;;  %v2448_v25 = vmov 0  }
 0x133   :  { %870 = vmatpush.bf16.msra.mxu0 %v2894_v20  ;;  %883 = vmatpush.bf16.msra.mxu1 %v2896_v21 }
 0x134   :  { %2082 = vset.pattern.permute.xlu2 %v2448_v25  ;;  %2083 = vset.pattern.permute.xlu0 %v2448_v25  ;;  %v1210_v25 = vld [vmem:[#allocation17] sm:$0xff] }
 0x135   :  { %924 = vperm.xlu2 %2082, %v921_v2   ;;  %v445_v2 = vld [vmem:[#allocation7] sm:$0xff] }
 0x136   :  { %899 = vmatpush.bf16.msra.mxu2 %v2912_v33  ;;  %912 = vmatpush.bf16.msra.mxu3 %v2914_v35  ;;  %v1016_v33 = vld [vmem:[#allocation13] sm:$0xff] }
 0x137   :  { %871 = vmatpush.bf16.msra.mxu0 %v2906_v59  ;;  %884 = vmatpush.bf16.msra.mxu1 %v2908_v4 }
 0x13a   :  { %900 = vmatpush.bf16.msra.mxu2 %v2924_v49  ;;  %913 = vmatpush.bf16.msra.mxu3 %v2926_v50 }
 0x13b   :  { %872 = vmatpush.bf16.msra.mxu0 %v2918_v16  ;;  %885 = vmatpush.bf16.msra.mxu1 %v2920_v46 }
 0x13d   :  { %1019 = vperm.xlu2 %2082, %v1016_v33  }
 0x13e   :  { %901 = vmatpush.bf16.msra.mxu2 %v1791_v0  ;;  %914 = vmatpush.bf16.msra.mxu3 %v1855_v8 }
 0x13f   :  { %873 = vmatpush.bf16.msra.mxu0 %v1803_v39  ;;  %886 = vmatpush.bf16.msra.mxu1 %v1867_v62  ;;  %v1015_v39 = vld [vmem:[#allocation11] sm:$0xff]  ;;  %v2119_v62 = vld [vmem:[%s3281_s0] sm:$0xff] }
 0x141   :  { %902 = vmatmul.bf16.vlgmr.msra.gmra.mxu2 %v864_v38  ;;  %915 = vmatmul.bf16.vlgmr.msra.gmra.mxu3 %v865_v40 }
 0x143   :  { %874 = vmatpush.bf16.msra.mxu0 %v1795_v19  ;;  %887 = vmatpush.bf16.msra.mxu1 %v1859_v22  ;;  %v2449_v22 = vmov 256.0  }
 0x144   :  { %2084 = vrcp.f32 %v2449_v22 }
 0x147   :  { %875 = vmatpush.bf16.msra.mxu0 %v1787_v5  ;;  %888 = vmatpush.bf16.msra.mxu1 %v1851_v28 }
 0x14a   :  { %876 = vmatmul.bf16.vlgmr.msra.gmra.mxu0 %v864_v38  ;;  %889 = vmatmul.bf16.vlgmr.msra.gmra.mxu1 %v865_v40  ;;  %v2085_v23 = vpop.eup %2084  ;;  %v1140_v38 = vld [vmem:[#allocation14] sm:$0xff] }
 0x14b   :  { %v1133_v13 = vmul.f32 256.0, %v2085_v23  ;;  %vm1137_vm11 = vweird.f32 %v2085_v23 }
 0x14d   :  { %v1134_v26 = vsub.f32 1.0, %v1133_v13 }
 0x14f   :  { %v1135_v27 = vmul.f32 %v2085_v23, %v1134_v26 }
 0x151   :  { %v1136_v5 = vadd.f32 %v2085_v23, %v1135_v27 }
 0x153   :  { %v1138_v28 = vsel %vm1137_vm11, %v2085_v23, %v1136_v5 }
 0x184   :  { %v2960_v53 = vpop.f32.mrf.mxu2  ;;  %v2962_v12 = vpop.f32.mrf.mxu3 }
 0x189   :  { %v2964_v54 = vpop.f32.mrf.mxu0  ;;  %v2966_v58 = vpop.f32.mrf.mxu1 }
 0x18c   :  { %v595_v61 = vpop.f32.mrf.mxu2  ;;  %v608_v3 = vpop.f32.mrf.mxu3 }
 0x18f   :  { %v925_v50 = vpop.permute.xlu2 %924 }
 0x191   :  { %v569_v7 = vpop.f32.mrf.mxu0  ;;  %v582_v14 = vpop.f32.mrf.mxu1 }
 0x192   :  { %v1164_v7 = vld [vmem:[#allocation16] sm:$0xff] }
 0x1a4   :  { %v844_v15 = vpop.f32.mrf.mxu2  ;;  %v857_v20 = vpop.f32.mrf.mxu3 }
 0x1a5   :  { %v858_v21 = vadd.f32 %v857_v20, %v844_v15 }
 0x1a7   :  { %966 = vmatpush.msrb.mxu1 %v858_v21 }
 0x1a8   :  { %1913 = vmatmul.msk.f32.vlgmr.msrb.gmra.mxu1 %vm927_vm10, %v920_v24 }
 0x1a9   :  { %v818_v9 = vpop.f32.mrf.mxu0  ;;  %v831_v59 = vpop.f32.mrf.mxu1 }
 0x1aa   :  { %v832_v4 = vadd.f32 %v831_v59, %v818_v9  ;;  %v1020_v9 = vpop.permute.xlu2 %1019 }
 0x1ac   :  { %946 = vmatpush.msrb.mxu0 %v832_v4  ;;  %v846_v31 = vpop.f32.mrf.mxu2  ;;  %v859_v32 = vpop.f32.mrf.mxu3 }
 0x1ad   :  { %1912 = vmatmul.msk.f32.vlgmr.msrb.gmra.mxu0 %vm927_vm10, %v920_v24 }
 0x1b1   :  { %v820_v35 = vpop.f32.mrf.mxu0  ;;  %v833_v36 = vpop.f32.mrf.mxu1 }
 0x1c4   :  { %v903_v41 = vpop.f32.mrf.mxu2  ;;  %v916_v42 = vpop.f32.mrf.mxu3 }
 0x1c5   :  { %v917_v43 = vadd.f32 %v916_v42, %v903_v41 }
 0x1c7   :  { %v877_v44 = vpop.f32.mrf.mxu0  ;;  %v890_v45 = vpop.f32.mrf.mxu1  ;;  %1006 = vmatpush.msrb.mxu3 %v917_v43 }
 0x1c8   :  { %v891_v16 = vadd.f32 %v890_v45, %v877_v44  ;;  %1915 = vmatmul.msk.f32.vlgmr.msrb.gmra.mxu3 %vm927_vm10, %v920_v24 }
 0x1ca   :  { %986 = vmatpush.msrb.mxu2 %v891_v16 }
 0x1cb   :  { %1914 = vmatmul.msk.f32.vlgmr.msrb.gmra.mxu2 %vm927_vm10, %v920_v24 }
 0x1cc   :  { %v905_v46 = vpop.f32.mrf.mxu2  ;;  %v918_v47 = vpop.f32.mrf.mxu3 }
 0x1cf   :  { %v879_v48 = vpop.f32.mrf.mxu0  ;;  %v892_v49 = vpop.f32.mrf.mxu1 }
 0x225   :  { %v968_v51 = vpop.f32.mrf.mxu1 }
 0x226   :  { %v969_v52 = vadd.f32 %v968_v51, %v925_v50 }
 0x228   :  { %v2975_v57 = vsub.f32 %v2118_v56, %v969_v52 }
 0x22a   :  { %v948_v55 = vpop.f32.mrf.mxu0  ;;  %1060 = vmatpush.msra.mxu1 %v2975_v57 }
 0x22b   :  { %v949_v37 = vadd.f32 %v948_v55, %v925_v50  ;;  %1917 = vmatmul.msk.f32.vlgmr.msra.gmra.mxu1 %vm927_vm10, %v1015_v39 }
 0x22d   :  { %v2980_v63 = vsub.f32 %v2119_v62, %v949_v37 }
 0x22f   :  { %1040 = vmatpush.msra.mxu0 %v2980_v63  ;;  %v1129_v34 = vadd.f32 %v2975_v57, %v2980_v63 }
 0x230   :  { %1916 = vmatmul.msk.f32.vlgmr.msra.gmra.mxu0 %vm927_vm10, %v1015_v39 }
 0x231   :  { %1130 = vadd.xlane.f32.xlu0 %v1129_v34 }
 0x24b   :  { %v1008_v0 = vpop.f32.mrf.mxu3 }
 0x24c   :  { %v1009_v8 = vadd.f32 %v1008_v0, %v925_v50 }
 0x24e   :  { %v988_v11 = vpop.f32.mrf.mxu2  ;;  %v2991_v17 = vsub.f32 %v2120_v6, %v1009_v8 }
 0x24f   :  { %v989_v1 = vadd.f32 %v988_v11, %v925_v50 }
 0x250   :  { %1100 = vmatpush.msra.mxu3 %v2991_v17 }
 0x251   :  { %v2996_v18 = vsub.f32 %v2121_v60, %v989_v1  ;;  %1919 = vmatmul.msk.f32.vlgmr.msra.gmra.mxu3 %vm927_vm10, %v1015_v39 }
 0x253   :  { %1080 = vmatpush.msra.mxu2 %v2996_v18  ;;  %v1173_v19 = vadd.f32 %v2991_v17, %v2996_v18 }
 0x254   :  { %1918 = vmatmul.msk.f32.vlgmr.msra.gmra.mxu2 %vm927_vm10, %v1015_v39  ;;  %v1205_v39 = vld [vmem:[%s3292_s11] sm:$0xff] }
 0x255   :  { %1174 = vadd.xlane.f32.xlu1 %v1173_v19 }
 0x2a4   :  { %v1131_v29 = vpop.xlane.xlu0 %1130 }
 0x2a5   :  { %v1139_v30 = vmul.f32 %v1138_v28, %v1131_v29 }
 0x2a7   :  { %1159 = vmatpush.msrb.mxu0 %v1139_v30 }
 0x2a8   :  { %1920 = vmatmul.msk.f32.vlgmr.msrb.gmra.mxu0 %vm927_vm10, %v1140_v38  ;;  %v1062_v20 = vpop.f32.mrf.mxu1 }
 0x2a9   :  { %v1063_v59 = vadd.f32 %v1062_v20, %v1020_v9 }
 0x2ab   :  { %v1106_v31 = vsub.f32 0.0, %v1063_v59 }
 0x2ad   :  { %v1042_v3 = vpop.f32.mrf.mxu0  ;;  %v1111_v33 = vmul.f32 1.442695, %v1106_v31 }
 0x2ae   :  { %v1043_v4 = vadd.f32 %v1042_v3, %v1020_v9 }
 0x2af   :  { %2086 = vpow2.f32 %v1111_v33 }
 0x2b0   :  { %v1105_v32 = vsub.f32 0.0, %v1043_v4 }
 0x2b2   :  { %v1109_v35 = vmul.f32 1.442695, %v1105_v32 }
 0x2b4   :  { %2088 = vpow2.f32 %v1109_v35 }
 0x2b5   :  { %v2087_v36 = vpop.eup %2086 }
 0x2b6   :  { %v1118_v42 = vadd.f32 1.0, %v2087_v36 }
 0x2b8   :  { %2090 = vrcp.f32 %v1118_v42 }
 0x2ba   :  { %v2089_v41 = vpop.eup %2088 }
 0x2bb   :  { %v1117_v43 = vadd.f32 1.0, %v2089_v41 }
 0x2bd   :  { %2092 = vrcp.f32 %v1117_v43 }
 0x2be   :  { %v2091_v44 = vpop.eup %2090 }
 0x2bf   :  { %v1126_v48 = vmul.f32 %v2091_v44, %v2975_v57 }
 0x2c3   :  { %v2093_v45 = vpop.eup %2092 }
 0x2c4   :  { %v1125_v49 = vmul.f32 %v2093_v45, %v2980_v63 }
 0x2c8   :  { %v1175_v40 = vpop.xlane.xlu1 %1174 }
 0x2c9   :  { %v1176_v61 = vmul.f32 %v1175_v40, %v1138_v28 }
 0x2cb   :  { %1192 = vmatpush.msrb.mxu1 %v1176_v61 }
 0x2cc   :  { %1921 = vmatmul.msk.f32.vlgmr.msrb.gmra.mxu1 %vm927_vm10, %v1140_v38 }
 0x2d4   :  { %v1102_v16 = vpop.f32.mrf.mxu3 }
 0x2d5   :  { %v1103_v52 = vadd.f32 %v1102_v16, %v1020_v9 }
 0x2d7   :  { %v1082_v46 = vpop.f32.mrf.mxu2  ;;  %v1108_v62 = vsub.f32 0.0, %v1103_v52 }
 0x2d8   :  { %v1083_v55 = vadd.f32 %v1082_v46, %v1020_v9 }
 0x2d9   :  { %v1115_v0 = vmul.f32 1.442695, %v1108_v62 }
 0x2da   :  { %v1107_v34 = vsub.f32 0.0, %v1083_v55 }
 0x2db   :  { %2094 = vpow2.f32 %v1115_v0 }
 0x325   :  { %v1161_v14 = vpop.f32.mrf.mxu0 }
 0x326   :  { %v1165_v15 = vadd.f32 %v1164_v7, %v1161_v14 }
 0x328   :  { %1168 = vperm.xlu2 %2082, %v1165_v15  }
 0x349   :  { %v1194_v21 = vpop.f32.mrf.mxu1 }
 0x34a   :  { %v1197_v24 = vadd.f32 %v1194_v21, %v1164_v7 }
 0x34c   :  { %1200 = vperm.xlu2 %2082, %v1197_v24  }
 0x354   :  { %1213 = vperm.xlu2 %2082, %v1210_v25  }
 0x35c   :  { %448 = vperm.xlu2 %2082, %v445_v2  }
 0x382   :  { %v1169_v47 = vpop.permute.xlu2 %1168 }
 0x383   :  { %v1171_v50 = vmul.f32 %v1169_v47, %v2980_v63  ;;  %v1172_v51 = vmul.f32 %v1169_v47, %v2975_v57  ;;  %v1113_v63 = vmul.f32 1.442695, %v1107_v34  ;;  %v2095_v57 = vpop.eup %2094 }
 0x384   :  { %v1120_v11 = vadd.f32 1.0, %v2095_v57 }
 0x385   :  { %v1206_v56 = vadd.f32 %v1171_v50, %v1125_v49  ;;  %v1207_v37 = vadd.f32 %v1172_v51, %v1126_v48  ;;  %2096 = vpow2.f32 %v1113_v63  ;;  %v1459_v63 = vld [vmem:[%s3282_s1 + $0xc0] sm:$0xff] }
 0x386   :  { %2098 = vrcp.f32 %v1120_v11 }
 0x387   :  { %1234 = vmatpush.msrb.mxu2 %v1206_v56  ;;  %1254 = vmatpush.msrb.mxu3 %v1207_v37 }
 0x388   :  { %1922 = vmatmul.msk.f32.vlgmr.msrb.gmra.mxu2 %vm927_vm10, %v1205_v39  ;;  %1923 = vmatmul.msk.f32.vlgmr.msrb.gmra.mxu3 %vm927_vm10, %v1205_v39 }
 0x38b   :  { %v2097_v8 = vpop.eup %2096 }
 0x38c   :  { %v1119_v6 = vadd.f32 1.0, %v2097_v8  ;;  %v2099_v1 = vpop.eup %2098  ;;  %v1460_v8 = vld [vmem:[%s3282_s1 + $0xc8] sm:$0xff] }
 0x38d   :  { %v1128_v23 = vmul.f32 %v2099_v1, %v2991_v17 }
 0x38e   :  { %2100 = vrcp.f32 %v1119_v6 }
 0x394   :  { %v2101_v60 = vpop.eup %2100 }
 0x395   :  { %v1127_v22 = vmul.f32 %v2101_v60, %v2996_v18 }
 0x3a6   :  { %v1201_v19 = vpop.permute.xlu2 %1200 }
 0x3a7   :  { %v1203_v13 = vmul.f32 %v1201_v19, %v2996_v18  ;;  %v1204_v26 = vmul.f32 %v1201_v19, %v2991_v17 }
 0x3a9   :  { %v1208_v27 = vadd.f32 %v1203_v13, %v1127_v22  ;;  %v1209_v5 = vadd.f32 %v1204_v26, %v1128_v23  ;;  %v1483_v13 = vld [vmem:[%s3282_s1 + $0xe0] sm:$0xff] }
 0x3ab   :  { %1274 = vmatpush.msra.mxu0 %v1208_v27  ;;  %1294 = vmatpush.msra.mxu1 %v1209_v5  ;;  %v1484_v27 = vld [vmem:[%s3282_s1 + $0xe8] sm:$0xff] }
 0x3ac   :  { %1924 = vmatmul.msk.f32.vlgmr.msra.gmra.mxu0 %vm927_vm10, %v1205_v39  ;;  %1925 = vmatmul.msk.f32.vlgmr.msra.gmra.mxu1 %vm927_vm10, %v1205_v39 }
 0x3ae   :  { %v1214_v28 = vpop.permute.xlu2 %1213 }
 0x3b6   :  { %v449_v21 = vpop.permute.xlu2 %448 }
 0x3b7   :  { %v568_v24 = vadd.f32 %v2964_v54, %v449_v21  ;;  %v581_v2 = vadd.f32 %v2966_v58, %v449_v21  ;;  %v594_v46 = vadd.f32 %v2960_v53, %v449_v21  ;;  %v607_v48 = vadd.f32 %v2962_v12, %v449_v21 }
 0x40b   :  { %v1236_v29 = vpop.f32.mrf.mxu2  ;;  %v1256_v30 = vpop.f32.mrf.mxu3 }
 0x40c   :  { %v1237_v38 = vadd.f32 %v1236_v29, %v1214_v28  ;;  %v1257_v40 = vadd.f32 %v1256_v30, %v1214_v28 }
 0x40e   :  { %v1299_v61 = vsub.f32 0.0, %v1237_v38  ;;  %v1300_v3 = vsub.f32 0.0, %v1257_v40 }
 0x410   :  { %v1303_v7 = vmul.f32 1.442695, %v1299_v61  ;;  %v1305_v14 = vmul.f32 1.442695, %v1300_v3  ;;  %v1435_v3 = vld [vmem:[%s3282_s1 + $0xa0] sm:$0xff] }
 0x412   :  { %2102 = vpow2.f32 %v1303_v7 }
 0x413   :  { %2104 = vpow2.f32 %v1305_v14  ;;  %v1436_v14 = vld [vmem:[%s3282_s1 + $0xa8] sm:$0xff] }
 0x418   :  { %v2103_v17 = vpop.eup %2102 }
 0x419   :  { %v2105_v18 = vpop.eup %2104  ;;  %v1311_v15 = vadd.f32 1.0, %v2103_v17 }
 0x41a   :  { %v1312_v20 = vadd.f32 1.0, %v2105_v18 }
 0x41b   :  { %2106 = vrcp.f32 %v1311_v15 }
 0x41c   :  { %2108 = vrcp.f32 %v1312_v20 }
 0x421   :  { %v2107_v25 = vpop.eup %2106 }
 0x422   :  { %v2109_v9 = vpop.eup %2108  ;;  %v1319_v59 = vmul.f32 %v2107_v25, %v568_v24 }
 0x423   :  { %v1320_v4 = vmul.f32 %v2109_v9, %v581_v2  ;;  %v1507_v2 = vld [vmem:[%s3282_s1 + $0x100] sm:$0xff] }
 0x424   :  { %1471 = vrot.lane.b32.xlu1 %v1319_v59, %s2442_s4  ;;  %1495 = vrot.lane.b32.xlu2 %v1319_v59, %s2440_s5 }
 0x425   :  { %1497 = vrot.lane.b32.xlu0 %v1320_v4, %s2440_s5  ;;  %v1419_v31 = vpack.c.bf16 %v1320_v4, %v1319_v59 }
 0x427   :  { %1421 = vst [vmem:[#allocation2 + $0x40] sm:$0xff] %v1419_v31  ;;  %v1508_v31 = vld [vmem:[%s3282_s1 + $0x108] sm:$0xff] }
 0x429   :  { %v1276_v32 = vpop.f32.mrf.mxu0  ;;  %v1296_v33 = vpop.f32.mrf.mxu1 }
 0x42a   :  { %v1277_v35 = vadd.f32 %v1276_v32, %v1214_v28  ;;  %v1297_v36 = vadd.f32 %v1296_v33, %v1214_v28  ;;  %v1509_v32 = vld [vmem:[%s3282_s1 + $0x110] sm:$0xff] }
 0x42b   :  { %v1437_v33 = vld [vmem:[%s3282_s1 + $0xb0] sm:$0xff] }
 0x42c   :  { %v1301_v41 = vsub.f32 0.0, %v1277_v35  ;;  %v1302_v54 = vsub.f32 0.0, %v1297_v36  ;;  %1423 = vrot.lane.b32.xlu1 %v1319_v59, %s2443_s24  ;;  %1447 = vrot.lane.b32.xlu2 %v1319_v59, %s2441_s20  ;;  %v1438_v35 = vld [vmem:[%s3282_s1 + $0xb8] sm:$0xff] }
 0x42d   :  { %1449 = vrot.lane.b32.xlu0 %v1320_v4, %s2441_s20 }
 0x42e   :  { %v1307_v58 = vmul.f32 1.442695, %v1301_v41  ;;  %v1309_v42 = vmul.f32 1.442695, %v1302_v54 }
 0x430   :  { %2110 = vpow2.f32 %v1307_v58 }
 0x431   :  { %2112 = vpow2.f32 %v1309_v42 }
 0x434   :  { %1373 = vrot.lane.b32.xlu1 %v1320_v4, %s2444_s25  ;;  %1371 = vrot.lane.b32.xlu2 %v1319_v59, %s2444_s25 }
 0x435   :  { %1473 = vrot.lane.b32.xlu0 %v1320_v4, %s2442_s4 }
 0x436   :  { %v2111_v43 = vpop.eup %2110 }
 0x437   :  { %v2113_v44 = vpop.eup %2112  ;;  %v1313_v45 = vadd.f32 1.0, %v2111_v43 }
 0x438   :  { %v1314_v16 = vadd.f32 1.0, %v2113_v44 }
 0x439   :  { %2114 = vrcp.f32 %v1313_v45 }
 0x43a   :  { %2116 = vrcp.f32 %v1314_v16 }
 0x43c   :  { %1397 = vrot.lane.b32.xlu1 %v1320_v4, %s2445_s26  ;;  %1395 = vrot.lane.b32.xlu2 %v1319_v59, %s2445_s26 }
 0x43d   :  { %1425 = vrot.lane.b32.xlu0 %v1320_v4, %s2443_s24 }
 0x43f   :  { %v2115_v47 = vpop.eup %2114 }
 0x440   :  { %v2117_v49 = vpop.eup %2116  ;;  %v1321_v50 = vmul.f32 %v2115_v47, %v594_v46 }
 0x441   :  { %v1322_v51 = vmul.f32 %v2117_v49, %v607_v48 }
 0x443   :  { %v1420_v52 = vpack.c.bf16 %v1322_v51, %v1321_v50 }
 0x444   :  { %1323 = vrot.lane.b32.xlu1 %v1319_v59, %s2446_s9  ;;  %1501 = vrot.lane.b32.xlu2 %v1322_v51, %s2440_s5 }
 0x445   :  { %1325 = vrot.lane.b32.xlu0 %v1320_v4, %s2446_s9  ;;  %1422 = vst [vmem:[#allocation2 + $0x48] sm:$0xff] %v1420_v52 }
 0x44c   :  { %1499 = vrot.lane.b32.xlu1 %v1321_v50, %s2440_s5  ;;  %1451 = vrot.lane.b32.xlu2 %v1321_v50, %s2441_s20 }
 0x44d   :  { %1349 = vrot.lane.b32.xlu0 %v1320_v4, %s2447_s6 }
 0x454   :  { %1347 = vrot.lane.b32.xlu1 %v1319_v59, %s2447_s6  ;;  %1475 = vrot.lane.b32.xlu2 %v1321_v50, %s2442_s4  ;;  %v1510_v59 = vld [vmem:[%s3282_s1 + $0x118] sm:$0xff] }
 0x455   :  { %1477 = vrot.lane.b32.xlu0 %v1322_v51, %s2442_s4 }
 0x45c   :  { %1453 = vrot.lane.b32.xlu1 %v1322_v51, %s2441_s20  ;;  %1427 = vrot.lane.b32.xlu2 %v1321_v50, %s2443_s24 }
 0x45d   :  { %1377 = vrot.lane.b32.xlu0 %v1322_v51, %s2444_s25 }
 0x464   :  { %1375 = vrot.lane.b32.xlu1 %v1321_v50, %s2444_s25  ;;  %1429 = vrot.lane.b32.xlu2 %v1322_v51, %s2443_s24 }
 0x465   :  { %1401 = vrot.lane.b32.xlu0 %v1322_v51, %s2445_s26 }
 0x46c   :  { %1351 = vrot.lane.b32.xlu1 %v1321_v50, %s2447_s6  ;;  %1329 = vrot.lane.b32.xlu2 %v1322_v51, %s2446_s9 }
 0x46d   :  { %1399 = vrot.lane.b32.xlu0 %v1321_v50, %s2445_s26 }
 0x474   :  { %1353 = vrot.lane.b32.xlu2 %v1322_v51, %s2447_s6 }
 0x47c   :  { %1327 = vrot.lane.b32.xlu2 %v1321_v50, %s2446_s9 }
 0x47e   :  { %v1496_v53 = vpop.permute.xlu2 %1495 }
 0x486   :  { %v3057_v12 = vpop.permute.xlu2 %1447 }
 0x48e   :  { %v3059_v55 = vpop.permute.xlu2 %1371 }
 0x496   :  { %v3061_v56 = vpop.permute.xlu1 %1471  ;;  %v3063_v37 = vpop.permute.xlu2 %1395 }
 0x497   :  { %v1498_v39 = vpop.permute.xlu0 %1497 }
 0x498   :  { %v1505_v9 = vsel %vm409_vm0, %v1496_v53, %v1498_v39 }
 0x499   :  { %v1511_v36 = vmul.f32 %v1507_v2, %v1505_v9 }
 0x49e   :  { %v1424_v62 = vpop.permute.xlu1 %1423  ;;  %v1502_v34 = vpop.permute.xlu2 %1501 }
 0x49f   :  { %v1450_v0 = vpop.permute.xlu0 %1449  ;;  %v1506_v4 = vsel %vm409_vm0, %v1502_v34, %v1496_v53 }
 0x4a0   :  { %v1457_v57 = vsel %vm359_vm2, %v3057_v12, %v1450_v0  ;;  %v1514_v41 = vmul.f32 %v1510_v59, %v1506_v4  ;;  %v1360_v4 = vld [vmem:[%s3282_s1 + $0x28] sm:$0xff] }
 0x4a1   :  { %v1463_v19 = vmul.f32 %v1459_v63, %v1457_v57  ;;  %v1335_v57 = vld [vmem:[%s3282_s1] sm:$0xff] }
 0x4a6   :  { %v3074_v11 = vpop.permute.xlu1 %1373  ;;  %v3076_v6 = vpop.permute.xlu2 %1451 }
 0x4a7   :  { %v1474_v1 = vpop.permute.xlu0 %1473  ;;  %v1456_v60 = vsel %vm359_vm2, %v1450_v0, %v3076_v6 }
 0x4a8   :  { %v1464_v22 = vmul.f32 %v1460_v8, %v1456_v60  ;;  %v1481_v26 = vsel %vm384_vm1, %v3061_v56, %v1474_v1  ;;  %v1486_v8 = vld [vmem:[%s3282_s1 + $0xf8] sm:$0xff] }
 0x4a9   :  { %v1487_v38 = vmul.f32 %v1483_v13, %v1481_v26 }
 0x4aa   :  { %v1467_v23 = vpack.c.bf16 %v1464_v22, %v1463_v19 }
 0x4ac   :  { %1469 = vst [vmem:[#allocation2 + $0x60] sm:$0xff] %v1467_v23 }
 0x4ae   :  { %v3090_v5 = vpop.permute.xlu1 %1397  ;;  %v1476_v28 = vpop.permute.xlu2 %1475 }
 0x4af   :  { %v1426_v29 = vpop.permute.xlu0 %1425  ;;  %v1480_v30 = vsel %vm384_vm1, %v1474_v1, %v1476_v28 }
 0x4b0   :  { %v1488_v40 = vmul.f32 %v1484_v27, %v1480_v30  ;;  %v1433_v7 = vsel %vm334_vm4, %v1424_v62, %v1426_v29 }
 0x4b1   :  { %v1439_v21 = vmul.f32 %v1435_v3, %v1433_v7 }
 0x4b2   :  { %v1491_v61 = vpack.c.bf16 %v1488_v40, %v1487_v38 }
 0x4b4   :  { %1493 = vst [vmem:[#allocation2 + $0x70] sm:$0xff] %v1491_v61 }
 0x4b6   :  { %v1324_v17 = vpop.permute.xlu1 %1323  ;;  %v1428_v18 = vpop.permute.xlu2 %1427 }
 0x4b7   :  { %v3102_v15 = vpop.permute.xlu0 %1325  ;;  %v1432_v20 = vsel %vm334_vm4, %v1426_v29, %v1428_v18  ;;  %v2122_v29 = vld [vmem:[%s3282_s1 + $0x8] sm:$0xff] }
 0x4b8   :  { %v1440_v24 = vmul.f32 %v1436_v14, %v1432_v20 }
 0x4ba   :  { %v1443_v25 = vpack.c.bf16 %v1440_v24, %v1439_v21 }
 0x4bb   :  { %v1978_v20 = vld [vmem:[#allocation2 + $0x70] sm:$0xf0] }
 0x4bc   :  { %1445 = vst [vmem:[#allocation2 + $0x50] sm:$0xff] %v1443_v25  ;;  %v1976_v25 = vld [vmem:[#allocation2 + $0x60] sm:$0xf] }
 0x4be   :  { %v1500_v54 = vpop.permute.xlu1 %1499  ;;  %v1430_v58 = vpop.permute.xlu2 %1429 }
 0x4bf   :  { %v3128_v42 = vpop.permute.xlu0 %1349  ;;  %v1503_v43 = vsel %vm409_vm0, %v1500_v54, %v1502_v34  ;;  %v1504_v44 = vsel %vm409_vm0, %v1498_v39, %v1500_v54  ;;  %v1431_v45 = vsel %vm334_vm4, %v1428_v18, %v1430_v58  ;;  %v1434_v16 = vsel %vm334_vm4, %v1430_v58, %v1424_v62  ;;  %v1485_v62 = vld [vmem:[%s3282_s1 + $0xf0] sm:$0xff]  ;;  %v1462_v54 = vld [vmem:[%s3282_s1 + $0xd8] sm:$0xff]  ;;  %v1359_v58 = vld [vmem:[%s3282_s1 + $0x20] sm:$0xff] }
 0x4c0   :  { %v1512_v46 = vmul.f32 %v1508_v31, %v1504_v44  ;;  %v1513_v47 = vmul.f32 %v1509_v32, %v1503_v43  ;;  %v1441_v48 = vmul.f32 %v1437_v33, %v1431_v45  ;;  %v1442_v49 = vmul.f32 %v1438_v35, %v1434_v16  ;;  %v1960_v35 = vld [vmem:[#allocation2 + $0x40] sm:$0xf] }
 0x4c1   :  { %v1333_v39 = vsel %vm230_vm7, %v1324_v17, %v3102_v15  ;;  %v1381_v43 = vsel %vm280_vm5, %v3059_v55, %v3074_v11  ;;  %v1383_v44 = vld [vmem:[%s3282_s1 + $0x40] sm:$0xff] }
 0x4c2   :  { %v1515_v50 = vpack.c.bf16 %v1512_v46, %v1511_v36  ;;  %v1516_v51 = vpack.c.bf16 %v1514_v41, %v1513_v47  ;;  %v1444_v52 = vpack.c.bf16 %v1442_v49, %v1441_v48  ;;  %v1340_v30 = vmul.f32 %v2122_v29, %v1333_v39  ;;  %v2050_v36 = vld [vmem:[#allocation2 + $0x44] sm:$0xf]  ;;  %v1461_v41 = vld [vmem:[%s3282_s1 + $0xd0] sm:$0xff]  ;;  %v2123_v39 = vld [vmem:[%s3282_s1 + $0x48] sm:$0xff] }
 0x4c3   :  { %v2052_v9 = vld [vmem:[#allocation2 + $0x4c] sm:$0xf0]  ;;  %v1962_v59 = vld [vmem:[#allocation2 + $0x50] sm:$0xf0] }
 0x4c4   :  { %v1594_v53 = vunpack.c.l.b16 %v1515_v50  ;;  %v1595_v0 = vunpack.c.h.b16 %v1515_v50  ;;  %v1596_v63 = vunpack.c.l.b16 %v1516_v51  ;;  %v1597_v34 = vunpack.c.h.b16 %v1516_v51  ;;  %1446 = vst [vmem:[#allocation2 + $0x58] sm:$0xff] %v1444_v52 }
 0x4c5   :  { %v1961_v46 = vor.u32 %v2052_v9, %v1960_v35  ;;  %v1965_v47 = vor.u32 %v2050_v36, %v1962_v59  ;;  %v1968_v35 = vld [vmem:[#allocation2 + $0x48] sm:$0xf]  ;;  %v1409_v36 = vld [vmem:[%s3282_s1 + $0x70] sm:$0xff] }
 0x4c6   :  { %v1348_v1 = vpop.permute.xlu1 %1347  ;;  %v3150_v60 = vpop.permute.xlu2 %1329  ;;  %v1614_v19 = vpack.c.b16 %v1594_v53, %v1594_v53  ;;  %v1615_v22 = vpack.c.b16 %v1595_v0, %v1595_v0  ;;  %v1616_v23 = vpack.c.b16 %v1596_v63, %v1596_v63  ;;  %v1617_v13 = vpack.c.b16 %v1597_v34, %v1597_v34 }
 0x4c7   :  { %v1478_v26 = vpop.permute.xlu0 %1477  ;;  %v1334_v27 = vsel %vm230_vm7, %v3150_v60, %v1324_v17  ;;  %v2056_v17 = vld [vmem:[#allocation2 + $0x6c] sm:$0xf0]  ;;  %v1357_v31 = vsel %vm255_vm8, %v1348_v1, %v3128_v42 }
 0x4c8   :  { %v1479_v38 = vsel %vm384_vm1, %v1476_v28, %v1478_v26  ;;  %v1482_v40 = vsel %vm384_vm1, %v1478_v26, %v3061_v56  ;;  %v1339_v61 = vmul.f32 %v1335_v57, %v1334_v27  ;;  %v1638_v14 = vsel %vm545_vm3, %v1614_v19, 0  ;;  %v2054_v56 = vld [vmem:[#allocation2 + $0x64] sm:$0xf]  ;;  %v1386_v19 = vld [vmem:[%s3282_s1 + $0x58] sm:$0xff] }
 0x4c9   :  { %v1489_v3 = vmul.f32 %v1485_v62, %v1479_v38  ;;  %v1490_v7 = vmul.f32 %v1486_v8, %v1482_v40  ;;  %v1641_v18 = vsel %vm545_vm3, %v1615_v22, 0  ;;  %1652 = vmatpush.bf16.msra.mxu2 %v1638_v14  ;;  %v1644_v24 = vsel %vm545_vm3, %v1616_v23, 0  ;;  %v1337_v22 = vld [vmem:[%s3282_s1 + $0x10] sm:$0xff]  ;;  %v1338_v27 = vld [vmem:[%s3282_s1 + $0x18] sm:$0xff] }
 0x4ca   :  { %v1343_v21 = vpack.c.bf16 %v1340_v30, %v1339_v61  ;;  %1665 = vmatpush.bf16.msra.mxu3 %v1641_v18  ;;  %v1647_v28 = vsel %vm545_vm3, %v1617_v13, 0  ;;  %1678 = vmatpush.bf16.msrb.mxu0 %v1644_v24  ;;  %v1977_v32 = vor.u32 %v2056_v17, %v1976_v25  ;;  %v1981_v33 = vor.u32 %v2054_v56, %v1978_v20  ;;  %v1407_v13 = vld [vmem:[%s3282_s1 + $0x60] sm:$0xff]  ;;  %v1538_v30 = vld [vmem:[#allocation20] sm:$0xff] }
 0x4cb   :  { %v1492_v2 = vpack.c.bf16 %v1490_v7, %v1489_v3  ;;  %1691 = vmatpush.bf16.msrb.mxu1 %v1647_v28  ;;  %v1364_v48 = vmul.f32 %v1360_v4, %v1357_v31  ;;  %v1405_v23 = vsel %vm305_vm6, %v3063_v37, %v3090_v5  ;;  %1541 = vperm.xlu0 %2083, %v1538_v30   ;;  %v2053_v31 = vld [vmem:[#allocation2 + $0x54] sm:$0xf0] }
 0x4cc   :  { %1345 = vst [vmem:[#allocation2] sm:$0xff] %v1343_v21 }
 0x4cd   :  { %1494 = vst [vmem:[#allocation2 + $0x78] sm:$0xff] %v1492_v2  ;;  %1653 = vmatpush.bf16.msra.mxu2 %v1977_v32  ;;  %v1970_v32 = vld [vmem:[#allocation2 + $0x58] sm:$0xf0] }
 0x4ce   :  { %v1454_v45 = vpop.permute.xlu1 %1453  ;;  %v3189_v16 = vpop.permute.xlu2 %1353  ;;  %1666 = vmatpush.bf16.msra.mxu3 %v1981_v33  ;;  %v1362_v33 = vld [vmem:[%s3282_s1 + $0x38] sm:$0xff] }
 0x4cf   :  { %v1378_v49 = vpop.permute.xlu0 %1377  ;;  %v1455_v50 = vsel %vm359_vm2, %v3076_v6, %v1454_v45  ;;  %v1458_v51 = vsel %vm359_vm2, %v1454_v45, %v3057_v12  ;;  %v1358_v52 = vsel %vm255_vm8, %v3189_v16, %v1348_v1  ;;  %v1388_v6 = vmul.f32 %v2123_v39, %v1381_v43  ;;  %v1408_v1 = vld [vmem:[%s3282_s1 + $0x68] sm:$0xff] }
 0x4d0   :  { %v1382_v53 = vsel %vm280_vm5, %v1378_v49, %v3059_v55  ;;  %v1465_v0 = vmul.f32 %v1461_v41, %v1455_v50  ;;  %v1466_v63 = vmul.f32 %v1462_v54, %v1458_v51  ;;  %v1363_v34 = vmul.f32 %v1359_v58, %v1358_v52  ;;  %v1385_v55 = vld [vmem:[%s3282_s1 + $0x50] sm:$0xff]  ;;  %v1410_v41 = vld [vmem:[%s3282_s1 + $0x78] sm:$0xff]  ;;  %v2051_v58 = vld [vmem:[#allocation2 + $0x4c] sm:$0xf] }
 0x4d1   :  { %v1387_v57 = vmul.f32 %v1383_v44, %v1382_v53  ;;  %1654 = vmatpush.bf16.msra.mxu2 %v1961_v46  ;;  %v1412_v21 = vmul.f32 %v1408_v1, %v1405_v23  ;;  %v1969_v46 = vor.u32 %v2053_v31, %v1968_v35 }
 0x4d2   :  { %v1468_v62 = vpack.c.bf16 %v1466_v63, %v1465_v0  ;;  %v1367_v8 = vpack.c.bf16 %v1364_v48, %v1363_v34  ;;  %1667 = vmatpush.bf16.msra.mxu3 %v1965_v47  ;;  %v1973_v47 = vor.u32 %v2051_v58, %v1970_v32 }
 0x4d3   :  { %v1391_v12 = vpack.c.bf16 %v1388_v6, %v1387_v57  ;;  %v1928_v10 = vld [vmem:[#allocation2] sm:$0xf] }
 0x4d4   :  { %1470 = vst [vmem:[#allocation2 + $0x68] sm:$0xff] %v1468_v62  ;;  %v2057_v25 = vld [vmem:[#allocation2 + $0x74] sm:$0xf0]  ;;  %v1986_v59 = vld [vmem:[#allocation2 + $0x78] sm:$0xf0] }
 0x4d5   :  { %1393 = vst [vmem:[#allocation2 + $0x20] sm:$0xff] %v1391_v12 }
 0x4d6   :  { %1369 = vst [vmem:[#allocation2 + $0x10] sm:$0xff] %v1367_v8  ;;  %v1376_v26 = vpop.permute.xlu1 %1375  ;;  %v1328_v29 = vpop.permute.xlu2 %1327 }
 0x4d7   :  { %v1402_v38 = vpop.permute.xlu0 %1401  ;;  %v1379_v40 = vsel %vm280_vm5, %v1376_v26, %v1378_v49  ;;  %v1380_v61 = vsel %vm280_vm5, %v3074_v11, %v1376_v26  ;;  %v1331_v3 = vsel %vm230_vm7, %v1328_v29, %v3150_v60  ;;  %v1332_v7 = vsel %vm230_vm7, %v3102_v15, %v1328_v29 }
 0x4d8   :  { %v1406_v14 = vsel %vm305_vm6, %v1402_v38, %v3063_v37  ;;  %v1389_v18 = vmul.f32 %v1385_v55, %v1380_v61  ;;  %v1390_v17 = vmul.f32 %v1386_v19, %v1379_v40  ;;  %v1341_v20 = vmul.f32 %v1337_v22, %v1332_v7  ;;  %v1361_v37 = vld [vmem:[%s3282_s1 + $0x30] sm:$0xff] }
 0x4d9   :  { %v1411_v24 = vmul.f32 %v1407_v13, %v1406_v14  ;;  %v1342_v28 = vmul.f32 %v1338_v27, %v1331_v3  ;;  %v1519_v19 = vld [vmem:[#allocation19] sm:$0xf] }
 0x4da   :  { %v1392_v11 = vpack.c.bf16 %v1390_v17, %v1389_v18 }
 0x4db   :  { %v1415_v2 = vpack.c.bf16 %v1412_v21, %v1411_v24  ;;  %v1344_v56 = vpack.c.bf16 %v1342_v28, %v1341_v20  ;;  %v1984_v60 = vld [vmem:[#allocation2 + $0x68] sm:$0xf]  ;;  %v2055_v9 = vld [vmem:[#allocation2 + $0x6c] sm:$0xf] }
 0x4dc   :  { %1394 = vst [vmem:[#allocation2 + $0x28] sm:$0xff] %v1392_v11  ;;  %v1985_v15 = vor.u32 %v2057_v25, %v1984_v60  ;;  %v1989_v4 = vor.u32 %v2055_v9, %v1986_v59  ;;  %v1944_v63 = vld [vmem:[#allocation2 + $0x20] sm:$0xf]  ;;  %v2046_v34 = vld [vmem:[#allocation2 + $0x24] sm:$0xf] }
 0x4dd   :  { %1417 = vst [vmem:[#allocation2 + $0x30] sm:$0xff] %v1415_v2  ;;  %v2044_v62 = vld [vmem:[#allocation2 + $0xc] sm:$0xf0]  ;;  %v1930_v8 = vld [vmem:[#allocation2 + $0x10] sm:$0xf0] }
 0x4de   :  { %1346 = vst [vmem:[#allocation2 + $0x8] sm:$0xff] %v1344_v56  ;;  %v1352_v54 = vpop.permute.xlu1 %1351  ;;  %1679 = vmatpush.bf16.msrb.mxu0 %v1985_v15  ;;  %1692 = vmatpush.bf16.msrb.mxu1 %v1989_v4  ;;  %v1929_v12 = vor.u32 %v2044_v62, %v1928_v10 }
 0x4df   :  { %v1400_v43 = vpop.permute.xlu0 %1399  ;;  %v1355_v44 = vsel %vm255_vm8, %v1352_v54, %v3189_v16  ;;  %v1356_v45 = vsel %vm255_vm8, %v3128_v42, %v1352_v54 }
 0x4e0   :  { %v1403_v48 = vsel %vm305_vm6, %v1400_v43, %v1402_v38  ;;  %v1404_v49 = vsel %vm305_vm6, %v3090_v5, %v1400_v43  ;;  %v1365_v50 = vmul.f32 %v1361_v37, %v1356_v45  ;;  %v1366_v51 = vmul.f32 %v1362_v33, %v1355_v44  ;;  %v2042_v5 = vld [vmem:[#allocation2 + $0x4] sm:$0xf] }
 0x4e1   :  { %v1413_v52 = vmul.f32 %v1409_v36, %v1404_v49  ;;  %v1414_v53 = vmul.f32 %v1410_v41, %v1403_v48  ;;  %v1933_v1 = vor.u32 %v2042_v5, %v1930_v8 }
 0x4e2   :  { %v1368_v0 = vpack.c.bf16 %v1366_v51, %v1365_v50  ;;  %1680 = vmatpush.bf16.msrb.mxu0 %v1969_v46  ;;  %1693 = vmatpush.bf16.msrb.mxu1 %v1973_v47 }
 0x4e3   :  { %v1416_v16 = vpack.c.bf16 %v1414_v53, %v1413_v52  ;;  %v1952_v55 = vld [vmem:[#allocation2 + $0x28] sm:$0xf]  ;;  %v2047_v23 = vld [vmem:[#allocation2 + $0x2c] sm:$0xf] }
 0x4e4   :  { %1370 = vst [vmem:[#allocation2 + $0x18] sm:$0xff] %v1368_v0  ;;  %v2048_v42 = vld [vmem:[#allocation2 + $0x2c] sm:$0xf0]  ;;  %v1946_v39 = vld [vmem:[#allocation2 + $0x30] sm:$0xf0] }
 0x4e5   :  { %1418 = vst [vmem:[#allocation2 + $0x38] sm:$0xff] %v1416_v16  ;;  %v1945_v6 = vor.u32 %v2048_v42, %v1944_v63  ;;  %v1949_v57 = vor.u32 %v2046_v34, %v1946_v39  ;;  %v1936_v38 = vld [vmem:[#allocation2 + $0x8] sm:$0xf]  ;;  %v2043_v40 = vld [vmem:[#allocation2 + $0xc] sm:$0xf] }
 0x4e7   :  { %1655 = vmatpush.bf16.msra.mxu2 %v1945_v6  ;;  %1668 = vmatpush.bf16.msra.mxu3 %v1949_v57 }
 0x4eb   :  { %1656 = vmatpush.bf16.msra.mxu2 %v1929_v12  ;;  %1669 = vmatpush.bf16.msra.mxu3 %v1933_v1  ;;  %v2045_v29 = vld [vmem:[#allocation2 + $0x14] sm:$0xf0]  ;;  %v1938_v30 = vld [vmem:[#allocation2 + $0x18] sm:$0xf0] }
 0x4ec   :  { %v2049_v22 = vld [vmem:[#allocation2 + $0x34] sm:$0xf0]  ;;  %v1954_v13 = vld [vmem:[#allocation2 + $0x38] sm:$0xf0]  ;;  %v1937_v61 = vor.u32 %v2045_v29, %v1936_v38  ;;  %v1941_v3 = vor.u32 %v2043_v40, %v1938_v30 }
 0x4ed   :  { %v1953_v26 = vor.u32 %v2049_v22, %v1952_v55  ;;  %v1957_v27 = vor.u32 %v2047_v23, %v1954_v13 }
 0x4ee   :  { %1990 = vmatmul.msk.bf16.vlgmr.msra.gmra.mxu2 %vm541_vm9, %v1519_v19  ;;  %1991 = vmatmul.msk.bf16.vlgmr.msra.gmra.mxu3 %vm541_vm9, %v1519_v19 }
 0x4ef   :  { %1681 = vmatpush.bf16.msrb.mxu0 %v1953_v26  ;;  %1694 = vmatpush.bf16.msrb.mxu1 %v1957_v27 }
 0x4f3   :  { %1682 = vmatpush.bf16.msrb.mxu0 %v1937_v61  ;;  %1695 = vmatpush.bf16.msrb.mxu1 %v1941_v3 }
 0x4f6   :  { %1992 = vmatmul.msk.bf16.vlgmr.msrb.gmra.mxu0 %vm541_vm9, %v1519_v19  ;;  %1993 = vmatmul.msk.bf16.vlgmr.msrb.gmra.mxu1 %vm541_vm9, %v1519_v19 }
 0x53d   :  { %v1542_v7 = vpop.permute.xlu0 %1541 }
 0x571   :  { %v1658_v14 = vpop.f32.mrf.mxu2  ;;  %v1671_v18 = vpop.f32.mrf.mxu3 }
 0x572   :  { %v1659_v17 = vadd.f32 %v1658_v14, %v1542_v7  ;;  %v1672_v20 = vadd.f32 %v1671_v18, %v1542_v7 }
 0x573   :  { %v1684_v21 = vpop.f32.mrf.mxu0  ;;  %v1697_v24 = vpop.f32.mrf.mxu1 }
 0x574   :  { %v1685_v28 = vadd.f32 %v1684_v21, %v1542_v7  ;;  %v1698_v11 = vadd.f32 %v1697_v24, %v1542_v7  ;;  %1701 = vst [vmem:[%s3296_s15] sm:$0xff] %v1659_v17 }
 0x575   :  { %1702 = vst [vmem:[%s3296_s15 + $0x8] sm:$0xff] %v1672_v20 }
 0x576   :  { %1703 = vst [vmem:[%s3296_s15 + $0x10] sm:$0xff] %v1685_v28 }
 0x577   :  { %1704 = vst [vmem:[%s3296_s15 + $0x18] sm:$0xff] %v1698_v11 }
 0x579   :  { %v1660_v25 = vpop.f32.mrf.mxu2  ;;  %v1673_v2 = vpop.f32.mrf.mxu3 }
 0x57b   :  { %v1686_v56 = vpop.f32.mrf.mxu0  ;;  %v1699_v60 = vpop.f32.mrf.mxu1 }
 0x57c   :  { %1709 = vsyncpa [#allocation4], 1 }
 0x57d   :  { %1710 = vsyncpa [#allocation6], 1 }
 0x57e   :  { %1711 = vsyncpa [#allocation9], 1 }
 0x57f   :  { %1712 = vsyncpa [#allocation12], 1 }
 0x580   :  { %1713 = vsyncpa [#allocation15], 1 }
 0x581   :  { %1714 = vsyncpa [#allocation18], 1 }
 0x582   :  { %1715 = vsyncpa [#allocation21], 1 }

</bundles_post_ra>
